<compile_context>
chip_gen: v7x
topology: tpu7x:2x2x1
jax: 0.10.0
libtpu: 0.0.40
codegen_flags: <defaults>
</compile_context>

<pallas_src>
import math
from functools import partial

import jax
import jax.numpy as jnp
import numpy as np
from jax.experimental import pallas as pl
from jax.experimental.pallas import tpu as pltpu

HIGHEST = jax.lax.Precision.HIGHEST  # only used by the pure-JAX reference


# --------------------------------------------------------------------------------------
# Fused kernel: conv1(+BN folded) + ReLU + SelfAttention + conv2   (one batch elem / step)
# --------------------------------------------------------------------------------------
def attcnn_kernel(H, W, n_chunks,
                  xcol_ref, w1_ref, b1_ref, wqkv_ref, bqkv_ref, w2t_ref, b2_ref,
                  out_ref, feat_ref, qkvb_ref, spad_ref):
    HW, Cf = feat_ref.shape
    CH = HW // n_chunks
    PAD = (spad_ref.shape[1] - HW) // 2          # halo width of the conv2 row buffer

    # ---- conv1 (+ folded bias/BN) as a single im2col matmul (K padded to 128), then ReLU
    feat = jnp.dot(xcol_ref[...], w1_ref[...],
                   preferred_element_type=jnp.float32)                 # (HW, Cf) f32
    feat = jnp.maximum(feat + b1_ref[...], 0.0)
    feat_ref[...] = feat

    # ---- fused Q|K|V projection: one (HW, Cf) @ (Cf, 3*Cf) matmul, bias in f32 ----
    qkv = jnp.dot(feat.astype(jnp.bfloat16), wqkv_ref[...],
                  preferred_element_type=jnp.float32) + bqkv_ref[...]  # (HW, 3*Cf)
    qkvb_ref[...] = qkv.astype(jnp.bfloat16)

    kb = qkvb_ref[:, Cf:2 * Cf]                  # (HW, Cf) bf16, loop-invariant
    vb = qkvb_ref[:, 2 * Cf:3 * Cf]              # (HW, Cf) bf16, loop-invariant

    # ---- attention, chunked over query rows so logits stay (CH, HW) = 16 vregs ----
    @pl.loop(0, n_chunks)
    def _(i):
        s = pl.multiple_of(i * CH, CH)
        q_c = qkvb_ref[pl.ds(s, CH), :Cf]                              # (CH, Cf) bf16
        logits = jax.lax.dot_general(q_c, kb, (((1,), (1,)), ((), ())),
                                     preferred_element_type=jnp.float32)   # (CH, HW)
        logits = logits - jnp.max(logits, axis=-1, keepdims=True)
        p = jnp.exp(logits)
        p = p * pl.reciprocal(jnp.sum(p, axis=-1, keepdims=True), approx=True)
        att_c = jnp.dot(p.astype(jnp.bfloat16), vb,
                        preferred_element_type=jnp.float32)            # (CH, Cf)
        # residual add in place (feat chunk is only needed for its own att chunk)
        feat_ref[pl.ds(s, CH), :] = feat_ref[pl.ds(s, CH), :] + att_c

    # ---- softmax over the width axis (torch Softmax(dim=-1) on NCHW) ----
    r = feat_ref[...].reshape(H, W, Cf)
    r = r - jnp.max(r, axis=1, keepdims=True)
    e = jnp.exp(r)
    r = e * pl.reciprocal(jnp.sum(e, axis=1, keepdims=True), approx=True)   # (H, W, Cf)

    # ---- conv2 (out_channels == 1): per-tap channel contraction as ONE matmul,
    #      then 9 shifted + masked adds from a halo-padded row buffer (no im2col) ----
    rb = r.reshape(HW, Cf).astype(jnp.bfloat16)
    taps = jax.lax.dot_general(w2t_ref[...], rb, (((1,), (1,)), ((), ())),
                               preferred_element_type=jnp.float32)     # (16, HW) f32
    nrow = spad_ref.shape[0]
    spad_ref[:, :PAD] = jnp.zeros((nrow, PAD), jnp.float32)            # zero halos every
    spad_ref[:, PAD + HW:] = jnp.zeros((nrow, PAD), jnp.float32)       # step (megacore-safe)
    spad_ref[:, PAD:PAD + HW] = taps

    col = jax.lax.broadcasted_iota(jnp.int32, (1, HW), 1) % W
    acc = jnp.zeros((1, HW), jnp.float32) + b2_ref[...]                # conv2 bias
    for t in range(9):
        dy, dx = divmod(t, 3)
        off = (dy - 1) * W + (dx - 1)
        row = spad_ref[t:t + 1, PAD + off:PAD + off + HW]              # (1, HW)
        if dx == 0:                                  # left tap invalid at x == 0
            row = jnp.where(col >= 1, row, 0.0)
        elif dx == 2:                                # right tap invalid at x == W-1
            row = jnp.where(col <= W - 2, row, 0.0)
        acc = acc + row                              # y out-of-range handled by zero halo
    out_ref[...] = acc.astype(out_ref.dtype)                           # lane-dense row


# --------------------------------------------------------------------------------------
# Wrapper: layout glue (NCHW->NHWC, pad, conv1 im2col, BN/bias folding) + pallas_call
# --------------------------------------------------------------------------------------
def _full_spec(a):
    return pl.BlockSpec(a.shape, lambda b, _n=a.ndim: (0,) * _n)


def attcnn_forward(x, adj, params, *, n_chunks=4):
    """x: (B, seq_length, H, W) float32 NCHW.  Returns (B, H, W)  (s2h=True path)."""
    del adj  # unused by the torch forward in the s2h=True path
    B, Cin, H, W = x.shape
    Cf = params["wq"].shape[0]
    HW = H * W
    assert HW % n_chunks == 0
    assert params["w2"].shape[-1] == 1, "fused conv2 path assumes out_channels == 1"
    Kp = ((9 * Cin + 127) // 128) * 128            # conv1 contraction padded to lane tiles
    pad = max(32, ((W + 1 + 31) // 32) * 32)       # conv2 row-buffer halo (>= W+1)

    # glue (trace-time XLA): NCHW -> NHWC, zero-pad, im2col for conv1
    xn = jnp.transpose(x, (0, 2, 3, 1))
    xp = jnp.pad(xn, ((0, 0), (1, 1), (1, 1), (0, 0)))                 # (B, H+2, W+2, Cin)
    cols = [xp[:, dy:dy + H, dx:dx + W, :].reshape(B, HW, Cin)
            for dy in range(3) for dx in range(3)]
    xcol = jnp.concatenate(cols, axis=-1)                              # (B, HW, 9*Cin)
    xcol = jnp.pad(xcol, ((0, 0), (0, 0), (0, Kp - 9 * Cin))).astype(jnp.bfloat16)

    # fold conv1 bias + eval-mode BatchNorm scale/bias into the conv1 weights/bias
    scale = params["bn_scale"]                                         # (1, Cf)
    w1f = params["w1"].reshape(9 * Cin, Cf) * scale
    w1f = jnp.pad(w1f, ((0, Kp - 9 * Cin), (0, 0))).astype(jnp.bfloat16)
    b1f = (params["b1"] * scale + params["bn_bias"]).astype(jnp.float32)

    # fused Q|K|V weights/biases
    wqkv = jnp.concatenate([params["wq"], params["wk"], params["wv"]],
                           axis=1).astype(jnp.bfloat16)                # (Cf, 3*Cf)
    bqkv = jnp.concatenate([params["bq"], params["bk"], params["bv"]],
                           axis=1).astype(jnp.float32)                 # (1, 3*Cf)

    # conv2 weight as a (16, Cf) per-tap matrix (rows 9..15 zero-padded)
    w2t = jnp.pad(params["w2"][:, :, 0], ((0, 16 - 9), (0, 0))).astype(jnp.bfloat16)
    b2 = params["b2"].astype(jnp.float32)                              # (1, 1)

    out = pl.pallas_call(
        partial(attcnn_kernel, H, W, n_chunks),
        out_shape=jax.ShapeDtypeStruct((B, 1, HW), jnp.float32),
        grid=(B,),
        in_specs=[
            pl.BlockSpec((pl.Squeezed(), HW, Kp), lambda b: (b, 0, 0)),
            _full_spec(w1f), _full_spec(b1f),
            _full_spec(wqkv), _full_spec(bqkv),
            _full_spec(w2t), _full_spec(b2),
        ],
        out_specs=pl.BlockSpec((pl.Squeezed(), 1, HW), lambda b: (b, 0, 0)),
        scratch_shapes=[
            pltpu.VMEM((HW, Cf), jnp.float32),             # feat / residual (in-place)
            pltpu.VMEM((HW, 3 * Cf), jnp.bfloat16),        # fused q|k|v (biased, bf16)
            pltpu.VMEM((16, HW + 2 * pad), jnp.float32),   # conv2 per-tap rows + halo
        ],
        compiler_params=pltpu.CompilerParams(dimension_semantics=("parallel",)),
    )(xcol, w1f, b1f, wqkv, bqkv, w2t, b2)

    return out.reshape(B, H, W)   # == torch output.squeeze(dim=1), out_channels == 1


# --------------------------------------------------------------------------------------
# Deterministic parameter init (shapes follow the torch module; weight layouts documented)
#   w1: (9, Cin, Cf)   == torch conv1.weight[o, i, kh, kw] transposed to [kh*3+kw, i, o]
#   wq/wk/wv: (Cf, Cf) == 1x1 conv weight[o, i, 1, 1] transposed to [i, o]
#   w2: (9, Cf, Cout)
# --------------------------------------------------------------------------------------
def init_params(key, cin, cf, cout=1):
    ks = jax.random.split(key, 12)

    def nrm(k, shape, scale):
        return (scale * jax.random.normal(k, shape, jnp.float32)).astype(jnp.float32)

    eps = 1e-5
    params = {
        "w1": nrm(ks[0], (9, cin, cf), 1.0 / math.sqrt(9 * cin)),
        "b1": nrm(ks[1], (1, cf), 0.1),
        # BatchNorm2d eval-mode defaults: gamma=1, beta=0, running_mean=0, running_var=1
        "bn_scale": jnp.full((1, cf), 1.0 / math.sqrt(1.0 + eps), jnp.float32),
        "bn_bias": jnp.zeros((1, cf), jnp.float32),
        "wq": nrm(ks[2], (cf, cf), 1.0 / math.sqrt(cf)),
        "bq": nrm(ks[3], (1, cf), 0.1),
        "wk": nrm(ks[4], (cf, cf), 1.0 / math.sqrt(cf)),
        "bk": nrm(ks[5], (1, cf), 0.1),
        "wv": nrm(ks[6], (cf, cf), 1.0 / math.sqrt(cf)),
        "bv": nrm(ks[7], (1, cf), 0.1),
        "w2": nrm(ks[8], (9, cf, cout), 1.0 / math.sqrt(9 * cf)),
        "b2": nrm(ks[9], (1, cout), 0.1),
    }
    return params


# --------------------------------------------------------------------------------------
# Pure-JAX reference (full f32, HIGHEST precision) for a smoke-test comparison
# --------------------------------------------------------------------------------------
def reference_forward(x, params):
    B, Cin, H, W = x.shape
    Cf = params["w1"].shape[-1]
    xn = jnp.transpose(x, (0, 2, 3, 1))
    w1 = params["w1"].reshape(3, 3, Cin, Cf)
    y = jax.lax.conv_general_dilated(
        xn, w1, (1, 1), "SAME",
        dimension_numbers=("NHWC", "HWIO", "NHWC"),
        precision=HIGHEST) + params["b1"][0]
    y = y * params["bn_scale"][0] + params["bn_bias"][0]
    y = jnp.maximum(y, 0.0)
    feat = y.reshape(B, H * W, Cf)
    q = jnp.einsum("bpc,cd->bpd", feat, params["wq"], precision=HIGHEST) + params["bq"][0]
    k = jnp.einsum("bpc,cd->bpd", feat, params["wk"], precision=HIGHEST) + params["bk"][0]
    v = jnp.einsum("bpc,cd->bpd", feat, params["wv"], precision=HIGHEST) + params["bv"][0]
    logits = jnp.einsum("bic,bjc->bij", q, k, precision=HIGHEST)
    p = jax.nn.softmax(logits, axis=-1)
    att = jnp.einsum("bij,bjc->bic", p, v, precision=HIGHEST)
    r = (att + feat).reshape(B, H, W, Cf)
    r = jax.nn.softmax(r, axis=2)   # torch Softmax(dim=-1) on NCHW == width axis
    w2 = params["w2"].reshape(3, 3, Cf, -1)
    o = jax.lax.conv_general_dilated(
        r, w2, (1, 1), "SAME",
        dimension_numbers=("NHWC", "HWIO", "NHWC"),
        precision=HIGHEST) + params["b2"][0]
    return o[..., 0]


if __name__ == "__main__":
    B, SEQ, H, W = 2, 8, 16, 16     # seq_length=8 input "channels", 16x16 spatial
    NF = 32                         # num_filters

    key = jax.random.PRNGKey(0)
    kx, kadj, kw = jax.random.split(key, 3)
    x = jax.random.normal(kx, (B, SEQ, H, W), jnp.float32)
    adj = jax.random.normal(kadj, (8, 8), jnp.float32)   # accepted but unused (s2h=True)
    params = init_params(kw, SEQ, NF, cout=1)

    fwd = jax.jit(lambda xx: attcnn_forward(xx, adj, params))
    out = jax.block_until_ready(fwd(x))
    assert out.shape == (B, H, W)

    ref = jax.block_until_ready(reference_forward(x, params))
    np.testing.assert_allclose(np.asarray(out), np.asarray(ref), rtol=5e-2, atol=5e-2)

    print("KERNEL_OK")
</pallas_src>

<mosaic_0001>
module attributes {stable_mosaic.version = 11 : i64} {
  func.func @attcnn_kernel(%arg0: i32, %arg1: memref<1x256x128xbf16, #tpu.memory_space<vmem>>, %arg2: memref<128x32xbf16, #tpu.memory_space<vmem>>, %arg3: memref<1x32xf32, #tpu.memory_space<vmem>>, %arg4: memref<32x96xbf16, #tpu.memory_space<vmem>>, %arg5: memref<1x96xf32, #tpu.memory_space<vmem>>, %arg6: memref<16x32xbf16, #tpu.memory_space<vmem>>, %arg7: memref<1x1xf32, #tpu.memory_space<vmem>>, %arg8: memref<1x1x256xf32, #tpu.memory_space<vmem>>, %arg9: memref<256x32xf32, #tpu.memory_space<vmem>>, %arg10: memref<256x96xbf16, #tpu.memory_space<vmem>>, %arg11: memref<16x320xf32, #tpu.memory_space<vmem>>) attributes {dimension_semantics = [#tpu.dimension_semantics<parallel>], iteration_bounds = array<i64: 2>, scalar_prefetch = 0 : i64, scratch_operands = 3 : i64, tpu.core_type = #tpu.core_type<tc>, window_params = [{transform_indices = @transform_0, window_bounds = array<i64: 1, 256, 128>}, {pipeline_mode = #tpu.pipeline_mode<synchronous>, transform_indices = @transform_1, window_bounds = array<i64: 128, 32>}, {pipeline_mode = #tpu.pipeline_mode<synchronous>, transform_indices = @transform_2, window_bounds = array<i64: 1, 32>}, {pipeline_mode = #tpu.pipeline_mode<synchronous>, transform_indices = @transform_3, window_bounds = array<i64: 32, 96>}, {pipeline_mode = #tpu.pipeline_mode<synchronous>, transform_indices = @transform_4, window_bounds = array<i64: 1, 96>}, {pipeline_mode = #tpu.pipeline_mode<synchronous>, transform_indices = @transform_5, window_bounds = array<i64: 16, 32>}, {pipeline_mode = #tpu.pipeline_mode<synchronous>, transform_indices = @transform_6, window_bounds = array<i64: 1, 1>}, {transform_indices = @transform_7, window_bounds = array<i64: 1, 1, 256>}]} {
    %c0 = arith.constant 0 : index
    %c0_0 = arith.constant 0 : index
    %c0_1 = arith.constant 0 : index
    %0 = vector.load %arg1[%c0, %c0_0, %c0_1] : memref<1x256x128xbf16, #tpu.memory_space<vmem>>, vector<1x256x128xbf16>
    %1 = vector.shape_cast %0 : vector<1x256x128xbf16> to vector<256x128xbf16>
    %c0_2 = arith.constant 0 : index
    %c0_3 = arith.constant 0 : index
    %2 = vector.load %arg2[%c0_2, %c0_3] : memref<128x32xbf16, #tpu.memory_space<vmem>>, vector<128x32xbf16>
    %cst = arith.constant dense<0.000000e+00> : vector<256x32xf32>
    %3 = tpu.matmul %1, %2, %cst {dimension_numbers = #tpu.dot_dimension_numbers<[1], [0], [0], [1], [0, 0, 1, 1], [], []>} : vector<256x128xbf16>, vector<128x32xbf16>, vector<256x32xf32> -> vector<256x32xf32>
    %c0_4 = arith.constant 0 : index
    %c0_5 = arith.constant 0 : index
    %4 = vector.load %arg3[%c0_4, %c0_5] : memref<1x32xf32, #tpu.memory_space<vmem>>, vector<1x32xf32>
    %5 = vector.broadcast %4 : vector<1x32xf32> to vector<256x32xf32>
    %6 = arith.addf %3, %5 : vector<256x32xf32>
    %cst_6 = arith.constant 0.000000e+00 : f32
    %7 = vector.broadcast %cst_6 : f32 to vector<256x32xf32>
    %8 = arith.maximumf %6, %7 : vector<256x32xf32>
    %c0_7 = arith.constant 0 : index
    %c0_8 = arith.constant 0 : index
    %9 = vector.load %arg9[%c0_7, %c0_8] : memref<256x32xf32, #tpu.memory_space<vmem>>, vector<256x32xf32>
    tpu.vector_store %arg9[%c0_7, %c0_8], %8 {strides = array<i32>} : memref<256x32xf32, #tpu.memory_space<vmem>>, vector<256x32xf32>,
    %10 = arith.truncf %8 : vector<256x32xf32> to vector<256x32xbf16>
    %c0_9 = arith.constant 0 : index
    %c0_10 = arith.constant 0 : index
    %11 = vector.load %arg4[%c0_9, %c0_10] : memref<32x96xbf16, #tpu.memory_space<vmem>>, vector<32x96xbf16>
    %cst_11 = arith.constant dense<0.000000e+00> : vector<256x96xf32>
    %12 = tpu.matmul %10, %11, %cst_11 {dimension_numbers = #tpu.dot_dimension_numbers<[1], [0], [0], [1], [0, 0, 1, 1], [], []>} : vector<256x32xbf16>, vector<32x96xbf16>, vector<256x96xf32> -> vector<256x96xf32>
    %c0_12 = arith.constant 0 : index
    %c0_13 = arith.constant 0 : index
    %13 = vector.load %arg5[%c0_12, %c0_13] : memref<1x96xf32, #tpu.memory_space<vmem>>, vector<1x96xf32>
    %14 = vector.broadcast %13 : vector<1x96xf32> to vector<256x96xf32>
    %15 = arith.addf %12, %14 : vector<256x96xf32>
    %16 = arith.truncf %15 : vector<256x96xf32> to vector<256x96xbf16>
    %c0_14 = arith.constant 0 : index
    %c0_15 = arith.constant 0 : index
    %17 = vector.load %arg10[%c0_14, %c0_15] : memref<256x96xbf16, #tpu.memory_space<vmem>>, vector<256x96xbf16>
    tpu.vector_store %arg10[%c0_14, %c0_15], %16 {strides = array<i32>} : memref<256x96xbf16, #tpu.memory_space<vmem>>, vector<256x96xbf16>,
    %c0_16 = arith.constant 0 : index
    %c32 = arith.constant 32 : index
    %18 = vector.load %arg10[%c0_16, %c32] : memref<256x96xbf16, #tpu.memory_space<vmem>>, vector<256x32xbf16>
    %c0_17 = arith.constant 0 : index
    %c64 = arith.constant 64 : index
    %19 = vector.load %arg10[%c0_17, %c64] : memref<256x96xbf16, #tpu.memory_space<vmem>>, vector<256x32xbf16>
    %c0_i32 = arith.constant 0 : i32
    %c4_i32 = arith.constant 4 : i32
    %20 = arith.addi %c0_i32, %c4_i32 : i32
    %c1_i32 = arith.constant 1 : i32
    scf.for %arg12 = %c0_i32 to %20 step %c1_i32  : i32 {
      %c1_i32_57 = arith.constant 1 : i32
      %108 = arith.muli %arg12, %c1_i32_57 : i32
      %c0_i32_58 = arith.constant 0 : i32
      %109 = arith.addi %c0_i32_58, %108 : i32
      %c64_i32 = arith.constant 64 : i32
      %110 = arith.muli %109, %c64_i32 : i32
      %111 = tpu.assume_multiple %110, 64 : i32
      %112 = arith.index_cast %111 : i32 to index
      %c0_59 = arith.constant 0 : index
      %113 = vector.load %arg10[%112, %c0_59] : memref<256x96xbf16, #tpu.memory_space<vmem>>, vector<64x32xbf16>
      %cst_60 = arith.constant dense<0.000000e+00> : vector<64x256xf32>
      %114 = tpu.matmul %113, %18, %cst_60 {dimension_numbers = #tpu.dot_dimension_numbers<[1], [1], [0], [0], [0, 0, 1, 0], [], []>} : vector<64x32xbf16>, vector<256x32xbf16>, vector<64x256xf32> -> vector<64x256xf32>
      %cst_61 = arith.constant dense<0xFF800000> : vector<64xf32>
      %115 = vector.multi_reduction <maximumf>, %114, %cst_61 [1] : vector<64x256xf32> to vector<64xf32>
      %116 = vector.shape_cast %115 : vector<64xf32> to vector<64x1xf32>
      %117 = vector.broadcast %116 : vector<64x1xf32> to vector<64x256xf32>
      %118 = arith.subf %114, %117 : vector<64x256xf32>
      %119 = math.exp %118 : vector<64x256xf32>
      %cst_62 = arith.constant dense<0.000000e+00> : vector<64xf32>
      %120 = vector.multi_reduction <add>, %119, %cst_62 [1] : vector<64x256xf32> to vector<64xf32>
      %121 = vector.shape_cast %120 : vector<64xf32> to vector<64x1xf32>
      %122 = tpu.reciprocal %121 {approx = true} : vector<64x1xf32> -> vector<64x1xf32>
      %123 = vector.broadcast %122 : vector<64x1xf32> to vector<64x256xf32>
      %124 = arith.mulf %119, %123 : vector<64x256xf32>
      %125 = arith.truncf %124 : vector<64x256xf32> to vector<64x256xbf16>
      %cst_63 = arith.constant dense<0.000000e+00> : vector<64x32xf32>
      %126 = tpu.matmul %125, %19, %cst_63 {dimension_numbers = #tpu.dot_dimension_numbers<[1], [0], [0], [1], [0, 0, 1, 1], [], []>} : vector<64x256xbf16>, vector<256x32xbf16>, vector<64x32xf32> -> vector<64x32xf32>
      %127 = arith.index_cast %111 : i32 to index
      %c0_64 = arith.constant 0 : index
      %128 = vector.load %arg9[%127, %c0_64] : memref<256x32xf32, #tpu.memory_space<vmem>>, vector<64x32xf32>
      %129 = arith.addf %128, %126 : vector<64x32xf32>
      %130 = arith.index_cast %111 : i32 to index
      %c0_65 = arith.constant 0 : index
      %131 = vector.load %arg9[%130, %c0_65] : memref<256x32xf32, #tpu.memory_space<vmem>>, vector<64x32xf32>
      tpu.vector_store %arg9[%130, %c0_65], %129 {strides = array<i32>} : memref<256x32xf32, #tpu.memory_space<vmem>>, vector<64x32xf32>,
    }
    %c4_i32_18 = arith.constant 4 : i32
    %c0_19 = arith.constant 0 : index
    %c0_20 = arith.constant 0 : index
    %21 = vector.load %arg9[%c0_19, %c0_20] : memref<256x32xf32, #tpu.memory_space<vmem>>, vector<256x32xf32>
    %22 = vector.shape_cast %21 : vector<256x32xf32> to vector<16x16x32xf32>
    %cst_21 = arith.constant dense<0xFF800000> : vector<16x32xf32>
    %23 = vector.multi_reduction <maximumf>, %22, %cst_21 [1] : vector<16x16x32xf32> to vector<16x32xf32>
    %24 = vector.shape_cast %23 : vector<16x32xf32> to vector<16x1x32xf32>
    %25 = vector.broadcast %24 : vector<16x1x32xf32> to vector<16x16x32xf32>
    %26 = arith.subf %22, %25 : vector<16x16x32xf32>
    %27 = math.exp %26 : vector<16x16x32xf32>
    %cst_22 = arith.constant dense<0.000000e+00> : vector<16x32xf32>
    %28 = vector.multi_reduction <add>, %27, %cst_22 [1] : vector<16x16x32xf32> to vector<16x32xf32>
    %29 = vector.shape_cast %28 : vector<16x32xf32> to vector<16x1x32xf32>
    %30 = tpu.reciprocal %29 {approx = true} : vector<16x1x32xf32> -> vector<16x1x32xf32>
    %31 = vector.broadcast %30 : vector<16x1x32xf32> to vector<16x16x32xf32>
    %32 = arith.mulf %27, %31 : vector<16x16x32xf32>
    %33 = vector.shape_cast %32 : vector<16x16x32xf32> to vector<256x32xf32>
    %34 = arith.truncf %33 : vector<256x32xf32> to vector<256x32xbf16>
    %c0_23 = arith.constant 0 : index
    %c0_24 = arith.constant 0 : index
    %35 = vector.load %arg6[%c0_23, %c0_24] : memref<16x32xbf16, #tpu.memory_space<vmem>>, vector<16x32xbf16>
    %cst_25 = arith.constant dense<0.000000e+00> : vector<16x256xf32>
    %36 = tpu.matmul %35, %34, %cst_25 {dimension_numbers = #tpu.dot_dimension_numbers<[1], [1], [0], [0], [0, 0, 1, 0], [], []>} : vector<16x32xbf16>, vector<256x32xbf16>, vector<16x256xf32> -> vector<16x256xf32>
    %cst_26 = arith.constant 0.000000e+00 : f32
    %37 = vector.broadcast %cst_26 : f32 to vector<16x32xf32>
    %c0_27 = arith.constant 0 : index
    %c0_28 = arith.constant 0 : index
    %38 = vector.load %arg11[%c0_27, %c0_28] : memref<16x320xf32, #tpu.memory_space<vmem>>, vector<16x32xf32>
    tpu.vector_store %arg11[%c0_27, %c0_28], %37 {strides = array<i32>} : memref<16x320xf32, #tpu.memory_space<vmem>>, vector<16x32xf32>,
    %cst_29 = arith.constant 0.000000e+00 : f32
    %39 = vector.broadcast %cst_29 : f32 to vector<16x32xf32>
    %c0_30 = arith.constant 0 : index
    %c288 = arith.constant 288 : index
    %40 = vector.load %arg11[%c0_30, %c288] : memref<16x320xf32, #tpu.memory_space<vmem>>, vector<16x32xf32>
    tpu.vector_store %arg11[%c0_30, %c288], %39 {strides = array<i32>} : memref<16x320xf32, #tpu.memory_space<vmem>>, vector<16x32xf32>,
    %c0_31 = arith.constant 0 : index
    %c32_32 = arith.constant 32 : index
    %41 = vector.load %arg11[%c0_31, %c32_32] : memref<16x320xf32, #tpu.memory_space<vmem>>, vector<16x256xf32>
    tpu.vector_store %arg11[%c0_31, %c32_32], %36 {strides = array<i32>} : memref<16x320xf32, #tpu.memory_space<vmem>>, vector<16x256xf32>,
    %42 = tpu.iota {dimensions = array<i32: 1>} : vector<1x256xi32>
    %c16_i32 = arith.constant 16 : i32
    %c0_i32_33 = arith.constant 0 : i32
    %43 = arith.cmpi eq, %c16_i32, %c0_i32_33 : i32
    %c1_i32_34 = arith.constant 1 : i32
    %44 = arith.select %43, %c1_i32_34, %c16_i32 : i32
    %45 = vector.broadcast %44 : i32 to vector<1x256xi32>
    %46 = arith.remsi %42, %45 : vector<1x256xi32>
    %c0_i32_35 = arith.constant 0 : i32
    %47 = vector.broadcast %c0_i32_35 : i32 to vector<1x256xi32>
    %48 = arith.cmpi ne, %46, %47 : vector<1x256xi32>
    %c0_i32_36 = arith.constant 0 : i32
    %49 = vector.broadcast %c0_i32_36 : i32 to vector<1x256xi32>
    %50 = arith.cmpi slt, %46, %49 : vector<1x256xi32>
    %c0_i32_37 = arith.constant 0 : i32
    %51 = arith.cmpi slt, %44, %c0_i32_37 : i32
    %52 = vector.broadcast %51 : i1 to vector<1x256xi1>
    %53 = vector.broadcast %52 : vector<1x256xi1> to vector<1x256xi1>
    %54 = arith.xori %50, %53 : vector<1x256xi1>
    %55 = arith.andi %54, %48 : vector<1x256xi1>
    %56 = vector.broadcast %44 : i32 to vector<1x256xi32>
    %57 = arith.addi %46, %56 : vector<1x256xi32>
    %58 = arith.select %55, %57, %46 : vector<1x256xi1>, vector<1x256xi32>
    %cst_38 = arith.constant 0.000000e+00 : f32
    %59 = vector.broadcast %cst_38 : f32 to vector<1x256xf32>
    %c0_39 = arith.constant 0 : index
    %c0_40 = arith.constant 0 : index
    %60 = vector.load %arg7[%c0_39, %c0_40] : memref<1x1xf32, #tpu.memory_space<vmem>>, vector<1x1xf32>
    %61 = vector.broadcast %60 : vector<1x1xf32> to vector<1x256xf32>
    %62 = arith.addf %59, %61 : vector<1x256xf32>
    %c0_41 = arith.constant 0 : index
    %c15 = arith.constant 15 : index
    %63 = vector.load %arg11[%c0_41, %c15] : memref<16x320xf32, #tpu.memory_space<vmem>>, vector<1x256xf32>
    %c1_i32_42 = arith.constant 1 : i32
    %64 = vector.broadcast %c1_i32_42 : i32 to vector<1x256xi32>
    %65 = arith.cmpi sge, %58, %64 : vector<1x256xi32>
    %cst_43 = arith.constant 0.000000e+00 : f32
    %66 = vector.broadcast %cst_43 : f32 to vector<1x256xf32>
    %67 = arith.select %65, %63, %66 : vector<1x256xi1>, vector<1x256xf32>
    %68 = arith.addf %62, %67 : vector<1x256xf32>
    %c1 = arith.constant 1 : index
    %c16 = arith.constant 16 : index
    %69 = vector.load %arg11[%c1, %c16] : memref<16x320xf32, #tpu.memory_space<vmem>>, vector<1x256xf32>
    %70 = arith.addf %68, %69 : vector<1x256xf32>
    %c2 = arith.constant 2 : index
    %c17 = arith.constant 17 : index
    %71 = vector.load %arg11[%c2, %c17] : memref<16x320xf32, #tpu.memory_space<vmem>>, vector<1x256xf32>
    %c14_i32 = arith.constant 14 : i32
    %72 = vector.broadcast %c14_i32 : i32 to vector<1x256xi32>
    %73 = arith.cmpi sle, %58, %72 : vector<1x256xi32>
    %cst_44 = arith.constant 0.000000e+00 : f32
    %74 = vector.broadcast %cst_44 : f32 to vector<1x256xf32>
    %75 = arith.select %73, %71, %74 : vector<1x256xi1>, vector<1x256xf32>
    %76 = arith.addf %70, %75 : vector<1x256xf32>
    %c3 = arith.constant 3 : index
    %c31 = arith.constant 31 : index
    %77 = vector.load %arg11[%c3, %c31] : memref<16x320xf32, #tpu.memory_space<vmem>>, vector<1x256xf32>
    %c1_i32_45 = arith.constant 1 : i32
    %78 = vector.broadcast %c1_i32_45 : i32 to vector<1x256xi32>
    %79 = arith.cmpi sge, %58, %78 : vector<1x256xi32>
    %cst_46 = arith.constant 0.000000e+00 : f32
    %80 = vector.broadcast %cst_46 : f32 to vector<1x256xf32>
    %81 = arith.select %79, %77, %80 : vector<1x256xi1>, vector<1x256xf32>
    %82 = arith.addf %76, %81 : vector<1x256xf32>
    %c4 = arith.constant 4 : index
    %c32_47 = arith.constant 32 : index
    %83 = vector.load %arg11[%c4, %c32_47] : memref<16x320xf32, #tpu.memory_space<vmem>>, vector<1x256xf32>
    %84 = arith.addf %82, %83 : vector<1x256xf32>
    %c5 = arith.constant 5 : index
    %c33 = arith.constant 33 : index
    %85 = vector.load %arg11[%c5, %c33] : memref<16x320xf32, #tpu.memory_space<vmem>>, vector<1x256xf32>
    %c14_i32_48 = arith.constant 14 : i32
    %86 = vector.broadcast %c14_i32_48 : i32 to vector<1x256xi32>
    %87 = arith.cmpi sle, %58, %86 : vector<1x256xi32>
    %cst_49 = arith.constant 0.000000e+00 : f32
    %88 = vector.broadcast %cst_49 : f32 to vector<1x256xf32>
    %89 = arith.select %87, %85, %88 : vector<1x256xi1>, vector<1x256xf32>
    %90 = arith.addf %84, %89 : vector<1x256xf32>
    %c6 = arith.constant 6 : index
    %c47 = arith.constant 47 : index
    %91 = vector.load %arg11[%c6, %c47] : memref<16x320xf32, #tpu.memory_space<vmem>>, vector<1x256xf32>
    %c1_i32_50 = arith.constant 1 : i32
    %92 = vector.broadcast %c1_i32_50 : i32 to vector<1x256xi32>
    %93 = arith.cmpi sge, %58, %92 : vector<1x256xi32>
    %cst_51 = arith.constant 0.000000e+00 : f32
    %94 = vector.broadcast %cst_51 : f32 to vector<1x256xf32>
    %95 = arith.select %93, %91, %94 : vector<1x256xi1>, vector<1x256xf32>
    %96 = arith.addf %90, %95 : vector<1x256xf32>
    %c7 = arith.constant 7 : index
    %c48 = arith.constant 48 : index
    %97 = vector.load %arg11[%c7, %c48] : memref<16x320xf32, #tpu.memory_space<vmem>>, vector<1x256xf32>
    %98 = arith.addf %96, %97 : vector<1x256xf32>
    %c8 = arith.constant 8 : index
    %c49 = arith.constant 49 : index
    %99 = vector.load %arg11[%c8, %c49] : memref<16x320xf32, #tpu.memory_space<vmem>>, vector<1x256xf32>
    %c14_i32_52 = arith.constant 14 : i32
    %100 = vector.broadcast %c14_i32_52 : i32 to vector<1x256xi32>
    %101 = arith.cmpi sle, %58, %100 : vector<1x256xi32>
    %cst_53 = arith.constant 0.000000e+00 : f32
    %102 = vector.broadcast %cst_53 : f32 to vector<1x256xf32>
    %103 = arith.select %101, %99, %102 : vector<1x256xi1>, vector<1x256xf32>
    %104 = arith.addf %98, %103 : vector<1x256xf32>
    %c0_54 = arith.constant 0 : index
    %c0_55 = arith.constant 0 : index
    %c0_56 = arith.constant 0 : index
    %105 = vector.load %arg8[%c0_54, %c0_55, %c0_56] : memref<1x1x256xf32, #tpu.memory_space<vmem>>, vector<1x1x256xf32>
    %106 = vector.shape_cast %105 : vector<1x1x256xf32> to vector<1x256xf32>
    %107 = vector.shape_cast %104 : vector<1x256xf32> to vector<1x1x256xf32>
    tpu.vector_store %arg8[%c0_54, %c0_55, %c0_56], %107 {strides = array<i32>} : memref<1x1x256xf32, #tpu.memory_space<vmem>>, vector<1x1x256xf32>,
    return
  }
  func.func @transform_0(%arg0: i32) -> (i32, i32, i32) {
    %c0_i32 = arith.constant 0 : i32
    %c0_i32_0 = arith.constant 0 : i32
    %c0_i32_1 = arith.constant 0 : i32
    return %arg0, %c0_i32, %c0_i32_0 : i32, i32, i32
  }
  func.func @transform_1(%arg0: i32) -> (i32, i32) {
    %c0_i32 = arith.constant 0 : i32
    %c0_i32_0 = arith.constant 0 : i32
    %c0_i32_1 = arith.constant 0 : i32
    return %c0_i32, %c0_i32_0 : i32, i32
  }
  func.func @transform_2(%arg0: i32) -> (i32, i32) {
    %c0_i32 = arith.constant 0 : i32
    %c0_i32_0 = arith.constant 0 : i32
    %c0_i32_1 = arith.constant 0 : i32
    return %c0_i32, %c0_i32_0 : i32, i32
  }
  func.func @transform_3(%arg0: i32) -> (i32, i32) {
    %c0_i32 = arith.constant 0 : i32
    %c0_i32_0 = arith.constant 0 : i32
    %c0_i32_1 = arith.constant 0 : i32
    return %c0_i32, %c0_i32_0 : i32, i32
  }
  func.func @transform_4(%arg0: i32) -> (i32, i32) {
    %c0_i32 = arith.constant 0 : i32
    %c0_i32_0 = arith.constant 0 : i32
    %c0_i32_1 = arith.constant 0 : i32
    return %c0_i32, %c0_i32_0 : i32, i32
  }
  func.func @transform_5(%arg0: i32) -> (i32, i32) {
    %c0_i32 = arith.constant 0 : i32
    %c0_i32_0 = arith.constant 0 : i32
    %c0_i32_1 = arith.constant 0 : i32
    return %c0_i32, %c0_i32_0 : i32, i32
  }
  func.func @transform_6(%arg0: i32) -> (i32, i32) {
    %c0_i32 = arith.constant 0 : i32
    %c0_i32_0 = arith.constant 0 : i32
    %c0_i32_1 = arith.constant 0 : i32
    return %c0_i32, %c0_i32_0 : i32, i32
  }
  func.func @transform_7(%arg0: i32) -> (i32, i32, i32) {
    %c0_i32 = arith.constant 0 : i32
    %c0_i32_0 = arith.constant 0 : i32
    %c0_i32_1 = arith.constant 0 : i32
    return %arg0, %c0_i32, %c0_i32_0 : i32, i32, i32
  }
}

</mosaic_0001>

<bundles_post_ra>
// kernel: _lambda_.1
= control target key start
LH: loop header
LB: loop body
LE: loop exit
PB: predicated region body
PF: predicated region fallthrough
CT: control target
= control target key end

     0   :  { %s3030_s26 = smov 0   ;;  %s3891_s0 = inlined_call_operand.vmem [shape: bf16[2,256,128], index: 0, kind: input, shape index: {}]   ;;  %s3892_s1 = inlined_call_operand.vmem [shape: bf16[128,32], index: 1, kind: input, shape index: {}]   ;;  %s3893_s2 = inlined_call_operand.vmem [shape: f32[1,32], index: 2, kind: input, shape index: {}]   ;;  %s3894_s3 = inlined_call_operand.vmem [shape: bf16[32,96], index: 3, kind: input, shape index: {}]   ;;  %s3895_s4 = inlined_call_operand.vmem [shape: f32[1,96], index: 4, kind: input, shape index: {}]   ;;  %s3896_s5 = inlined_call_operand.vmem [shape: bf16[16,32], index: 5, kind: input, shape index: {}]   ;;  %s3897_s6 = inlined_call_operand.<no memory space> [shape: f32[1,1], index: 6, kind: input, shape index: {}]   ;;  %s3898_s7 = inlined_call_operand.vmem [shape: f32[2,1,256], index: 7, kind: output, shape index: {}]  }
   0x1   :  { %v12_v0 = vstv %s3897_s6 }
   0x2   :  { %13 = vst [vmem:[#allocation5] sm:$0x1] %v12_v0 }
   0x3 LB: > { %s2466_s27 = sadd.s32 4294967295, %s2966_s26   ;;  %p2470_p0 = scmp.ge.s32.totalorder %s2966_s26, 1  ;;  %s2966_s26 = sphi %s3030_s26, %s19_s26  }
   0x4   : > { %p239_p1 = scmp.lt.s32.totalorder %s2966_s26, 3 }
   0x6   : > { %p240_p2 = pnand %p2470_p0, %p239_p1 }
   0x7   : > { %v2784_v1 = vld [vmem:[%s3892_s1] sm:$0xff] (!%p240_p2)   ;;  %p270_p3 = scmp.lt.s32.totalorder (!%p240_p2), %s2466_s27, 1  ;;  %v2785_v2 = vld [vmem:[%s3892_s1 + $0x8] sm:$0xff] (!%p240_p2)   ;;  %v2786_v3 = vld [vmem:[%s3892_s1 + $0x10] sm:$0xff] (!%p240_p2)   ;;  %vm672_vm0 = vcmask (!%p240_p2), 261120   ;;  %vm969_vm1 = vcmask (!%p240_p2), 785408  }
   0x8   : > { %243 = sbr.rel (%p240_p2) target bundleno = 2247 (0x8c7), region = 48  ;;  %2653 = vmatprep.subr.bf16.mxu0 (!%p240_p2), %v2784_v1  ;;  %v2787_v4 = vld [vmem:[%s3892_s1 + $0x18] sm:$0xff] (!%p240_p2)   ;;  %v2788_v6 = vld [vmem:[%s3892_s1 + $0x20] sm:$0xff] (!%p240_p2)   ;;  %v2789_v7 = vld [vmem:[%s3892_s1 + $0x28] sm:$0xff] (!%p240_p2)  }
   0x9   : > { %2654 = vmatpush3.bf16.msra.mxu0 (!%p240_p2), %v2784_v1  ;;  %v2790_v8 = vld [vmem:[%s3892_s1 + $0x30] sm:$0xff] (!%p240_p2)   ;;  %v2791_v9 = vld [vmem:[%s3892_s1 + $0x38] sm:$0xff] (!%p240_p2)   ;;  %v2808_v25 = vld [vmem:[%s3894_s3] sm:$0xff] (!%p240_p2)  }
   0xa   : > { %2655 = vmatprep.subr.bf16.mxu0 (!%p240_p2), %v2785_v2  ;;  %2701 = vmatprep.subr.bf16.mxu1 (!%p240_p2), %v2808_v25  ;;  %v2809_v26 = vld [vmem:[%s3894_s3 + $0x8] sm:$0xff] (!%p240_p2)   ;;  %v3097_v27 = vld [vmem:[%s3893_s2] ss:$0 sm:$0xff] (!%p240_p2) }
   0xb   : > { %2702 = vmatpush3.bf16.msra.mxu1 (!%p240_p2), %v2808_v25 }
   0xc   : > { %2703 = vmatprep.subr.bf16.mxu1 (!%p240_p2), %v2809_v26 }
   0xd   : > { %2656 = vmatpush3.bf16.msra.mxu0 (!%p240_p2), %v2785_v2 }
   0xe   : > { %2657 = vmatprep.subr.bf16.mxu0 (!%p240_p2), %v2786_v3 }
   0xf   : > { %s3908_s27 = smov (!%p270_p3, %s2466_s27), 1  ;;  %2704 = vmatpush3.bf16.msra.mxu1 %v2809_v26 }
  0x10   : > { %s2528_s10 = sshll.u32 %s3908_s27, 7  ;;  %s2473_s14 = sshll.u32 %s3908_s27, 1 }
  0x11   : > { %s3050_s13 = scalar_lea.vmem %s3891_s0, %s2528_s10  ;;  %s3055_s17 = scalar_lea.vmem %s3898_s7, %s2473_s14  ;;  %2658 = vmatpush3.bf16.msra.mxu0 %v2786_v3 }
  0x12   : > { %v2792_v5 = vld [vmem:[%s3050_s13] sm:$0xff]   ;;  %2659 = vmatprep.subr.bf16.mxu0 %v2787_v4  ;;  %v2793_v10 = vld [vmem:[%s3050_s13 + $0x8] sm:$0xff]   ;;  %v2794_v11 = vld [vmem:[%s3050_s13 + $0x10] sm:$0xff]  }
  0x13   : > { %2669 = vmatprep.mubr.bf16.mxu0 %v2792_v5  ;;  %v2795_v12 = vld [vmem:[%s3050_s13 + $0x18] sm:$0xff]   ;;  %v2796_v13 = vld [vmem:[%s3050_s13 + $0x20] sm:$0xff]   ;;  %v2797_v14 = vld [vmem:[%s3050_s13 + $0x28] sm:$0xff]  }
  0x14   : > { %v2798_v15 = vld [vmem:[%s3050_s13 + $0x30] sm:$0xff]   ;;  %v2799_v16 = vld [vmem:[%s3050_s13 + $0x38] sm:$0xff]   ;;  %v2800_v17 = vld [vmem:[%s3050_s13 + $0x40] sm:$0xff]  }
  0x15   : > { %2660 = vmatpush3.bf16.msra.mxu0 %v2787_v4  ;;  %v2801_v18 = vld [vmem:[%s3050_s13 + $0x48] sm:$0xff]   ;;  %v2802_v19 = vld [vmem:[%s3050_s13 + $0x50] sm:$0xff]   ;;  %v2803_v20 = vld [vmem:[%s3050_s13 + $0x58] sm:$0xff]  }
  0x16   : > { %2661 = vmatprep.subr.bf16.mxu0 %v2788_v6  ;;  %v2804_v21 = vld [vmem:[%s3050_s13 + $0x60] sm:$0xff]   ;;  %v2805_v22 = vld [vmem:[%s3050_s13 + $0x68] sm:$0xff]   ;;  %v2806_v23 = vld [vmem:[%s3050_s13 + $0x70] sm:$0xff]  }
  0x17   : > { %v2807_v24 = vld [vmem:[%s3050_s13 + $0x78] sm:$0xff]   ;;  %s3264_s13 = smov 0  }
  0x19   : > { %2662 = vmatpush3.bf16.msra.mxu0 %v2788_v6 }
  0x1a   : > { %2663 = vmatprep.subr.bf16.mxu0 %v2789_v7 }
  0x1d   : > { %2664 = vmatpush3.bf16.msra.mxu0 %v2789_v7 }
  0x1e   : > { %2665 = vmatprep.subr.bf16.mxu0 %v2790_v8 }
  0x21   : > { %2666 = vmatpush3.bf16.msra.mxu0 %v2790_v8 }
  0x22   : > { %2667 = vmatprep.subr.bf16.mxu0 %v2791_v9 }
  0x25   : > { %2668 = vmatpush3.bf16.msra.mxu0 %v2791_v9 }
  0x28   : > { %2670 = vmatmul.mubr.bf16.vlgmr.msra.gmra.mrb[0].mxu0 %v2793_v10 }
  0x29   : > { %2673 = vmatprep.mubr.bf16.mxu0 %v2794_v11 }
  0x30   : > { %2674 = vmatmul.mubr.bf16.gmra.mrb[4].mxu0 %v2795_v12 }
  0x31   : > { %2677 = vmatprep.mubr.bf16.mxu0 %v2796_v13 }
  0x38   : > { %2678 = vmatmul.mubr.bf16.gmra.mrb[8].mxu0 %v2797_v14 }
  0x39   : > { %2681 = vmatprep.mubr.bf16.mxu0 %v2798_v15 }
  0x40   : > { %2682 = vmatmul.mubr.bf16.gmra.mrb[12].mxu0 %v2799_v16 }
  0x41   : > { %2685 = vmatprep.mubr.bf16.mxu0 %v2800_v17 }
  0x48   : > { %2686 = vmatmul.mubr.bf16.gmra.mrb[16].mxu0 %v2801_v18 }
  0x49   : > { %2689 = vmatprep.mubr.bf16.mxu0 %v2802_v19 }
  0x50   : > { %2690 = vmatmul.mubr.bf16.gmra.mrb[20].mxu0 %v2803_v20 }
  0x51   : > { %2693 = vmatprep.mubr.bf16.mxu0 %v2804_v21 }
  0x58   : > { %2694 = vmatmul.mubr.bf16.gmra.mrb[24].mxu0 %v2805_v22 }
  0x59   : > { %2697 = vmatprep.mubr.bf16.mxu0 %v2806_v23 }
  0x60   : > { %2698 = vmatmul.mubr.bf16.gmra.mrb[28].mxu0 %v2807_v24 }
  0xfb   : > { %v2671_v28 = vpop.f32.mrb[0].mxu0 }
  0xfc   : > { %v522_v29 = vadd.f32 %v2671_v28, %v3097_v27  ;;  %v513_v30 = vpop.f32.mrb[1].mxu0 }
  0xfd   : > { %v514_v31 = vadd.f32 %v3097_v27, %v513_v30  ;;  %v2672_v32 = vpop.f32.mrb[2].mxu0 }
  0xfe   : > { %v642_v33 = vmax.f32 %v522_v29, 0.0  ;;  %v525_v34 = vadd.f32 %v2672_v32, %v3097_v27  ;;  %v516_v35 = vpop.f32.mrb[3].mxu0 }
  0xff   : > { %v640_v36 = vmax.f32 %v514_v31, 0.0  ;;  %v517_v37 = vadd.f32 %v3097_v27, %v516_v35 }
 0x100   : > { %675 = vst.msk [vmem:[#allocation2 + $0x10] sm:$0xff] %vm672_vm0, %v642_v33  ;;  %v643_v38 = vmax.f32 %v525_v34, 0.0 }
 0x101   : > { %673 = vst.msk [vmem:[#allocation2] sm:$0xff] %vm672_vm0, %v640_v36  ;;  %v641_v39 = vmax.f32 %v517_v37, 0.0 }
 0x102   : > { %676 = vst.msk [vmem:[#allocation2 + $0x18] sm:$0xff] %vm672_vm0, %v643_v38  ;;  %v706_v40 = vpack.c.bf16 %v643_v38, %v642_v33 }
 0x103   : > { %674 = vst.msk [vmem:[#allocation2 + $0x8] sm:$0xff] %vm672_vm0, %v641_v39  ;;  %v2675_v41 = vpop.f32.mrb[4].mxu0  ;;  %v705_v42 = vpack.c.bf16 %v641_v39, %v640_v36 }
 0x104   : > { %v538_v43 = vadd.f32 %v2675_v41, %v3097_v27  ;;  %v529_v44 = vpop.f32.mrb[5].mxu0 }
 0x105   : > { %v530_v45 = vadd.f32 %v3097_v27, %v529_v44  ;;  %v2676_v46 = vpop.f32.mrb[6].mxu0  ;;  %2705 = vmatprep.mubr.msk.bf16.mxu1 %vm672_vm0, %v705_v42 }
 0x106   : > { %v646_v47 = vmax.f32 %v538_v43, 0.0  ;;  %v541_v48 = vadd.f32 %v2676_v46, %v3097_v27  ;;  %v532_v49 = vpop.f32.mrb[7].mxu0  ;;  %2706 = vmatmul.mubr.msk.bf16.vlgmr.msra.gmra.mrb[0].mxu1 %vm672_vm0, %v706_v40 }
 0x107   : > { %v644_v50 = vmax.f32 %v530_v45, 0.0  ;;  %v533_v51 = vadd.f32 %v3097_v27, %v532_v49 }
 0x108   : > { %679 = vst.msk [vmem:[#allocation2 + $0x30] sm:$0xff] %vm672_vm0, %v646_v47  ;;  %v647_v52 = vmax.f32 %v541_v48, 0.0 }
 0x109   : > { %677 = vst.msk [vmem:[#allocation2 + $0x20] sm:$0xff] %vm672_vm0, %v644_v50  ;;  %v645_v53 = vmax.f32 %v533_v51, 0.0 }
 0x10a   : > { %680 = vst.msk [vmem:[#allocation2 + $0x38] sm:$0xff] %vm672_vm0, %v647_v52  ;;  %v708_v54 = vpack.c.bf16 %v647_v52, %v646_v47 }
 0x10b   : > { %678 = vst.msk [vmem:[#allocation2 + $0x28] sm:$0xff] %vm672_vm0, %v645_v53  ;;  %v707_v55 = vpack.c.bf16 %v645_v53, %v644_v50  ;;  %v2679_v56 = vpop.f32.mrb[8].mxu0 }
 0x10c   : > { %v554_v57 = vadd.f32 %v2679_v56, %v3097_v27  ;;  %v545_v58 = vpop.f32.mrb[9].mxu0 }
 0x10d   : > { %v546_v59 = vadd.f32 %v3097_v27, %v545_v58  ;;  %v2680_v60 = vpop.f32.mrb[10].mxu0  ;;  %2709 = vmatprep.mubr.msk.bf16.mxu1 %vm672_vm0, %v707_v55 }
 0x10e   : > { %v650_v61 = vmax.f32 %v554_v57, 0.0  ;;  %v557_v62 = vadd.f32 %v2680_v60, %v3097_v27  ;;  %v548_v63 = vpop.f32.mrb[11].mxu0  ;;  %2710 = vmatmul.mubr.msk.bf16.gmra.mrb[4].mxu1 %vm672_vm0, %v708_v54 }
 0x10f   : > { %v648_v0 = vmax.f32 %v546_v59, 0.0  ;;  %v549_v1 = vadd.f32 %v3097_v27, %v548_v63 }
 0x110   : > { %683 = vst.msk [vmem:[#allocation2 + $0x50] sm:$0xff] %vm672_vm0, %v650_v61  ;;  %v651_v2 = vmax.f32 %v557_v62, 0.0 }
 0x111   : > { %681 = vst.msk [vmem:[#allocation2 + $0x40] sm:$0xff] %vm672_vm0, %v648_v0  ;;  %v649_v3 = vmax.f32 %v549_v1, 0.0 }
 0x112   : > { %684 = vst.msk [vmem:[#allocation2 + $0x58] sm:$0xff] %vm672_vm0, %v651_v2  ;;  %v710_v4 = vpack.c.bf16 %v651_v2, %v650_v61 }
 0x113   : > { %682 = vst.msk [vmem:[#allocation2 + $0x48] sm:$0xff] %vm672_vm0, %v649_v3  ;;  %v709_v5 = vpack.c.bf16 %v649_v3, %v648_v0  ;;  %v2683_v6 = vpop.f32.mrb[12].mxu0 }
 0x114   : > { %v570_v7 = vadd.f32 %v2683_v6, %v3097_v27  ;;  %v561_v8 = vpop.f32.mrb[13].mxu0 }
 0x115   : > { %v562_v9 = vadd.f32 %v3097_v27, %v561_v8  ;;  %v2684_v10 = vpop.f32.mrb[14].mxu0  ;;  %2713 = vmatprep.mubr.msk.bf16.mxu1 %vm672_vm0, %v709_v5 }
 0x116   : > { %v654_v11 = vmax.f32 %v570_v7, 0.0  ;;  %v573_v12 = vadd.f32 %v2684_v10, %v3097_v27  ;;  %v564_v13 = vpop.f32.mrb[15].mxu0  ;;  %2714 = vmatmul.mubr.msk.bf16.gmra.mrb[8].mxu1 %vm672_vm0, %v710_v4 }
 0x117   : > { %v652_v14 = vmax.f32 %v562_v9, 0.0  ;;  %v565_v15 = vadd.f32 %v3097_v27, %v564_v13 }
 0x118   : > { %687 = vst.msk [vmem:[#allocation2 + $0x70] sm:$0xff] %vm672_vm0, %v654_v11  ;;  %v655_v16 = vmax.f32 %v573_v12, 0.0 }
 0x119   : > { %685 = vst.msk [vmem:[#allocation2 + $0x60] sm:$0xff] %vm672_vm0, %v652_v14  ;;  %v653_v17 = vmax.f32 %v565_v15, 0.0 }
 0x11a   : > { %688 = vst.msk [vmem:[#allocation2 + $0x78] sm:$0xff] %vm672_vm0, %v655_v16  ;;  %v712_v18 = vpack.c.bf16 %v655_v16, %v654_v11 }
 0x11b   : > { %686 = vst.msk [vmem:[#allocation2 + $0x68] sm:$0xff] %vm672_vm0, %v653_v17  ;;  %v711_v19 = vpack.c.bf16 %v653_v17, %v652_v14  ;;  %v2687_v20 = vpop.f32.mrb[16].mxu0 }
 0x11c   : > { %v586_v21 = vadd.f32 %v2687_v20, %v3097_v27  ;;  %v577_v22 = vpop.f32.mrb[17].mxu0 }
 0x11d   : > { %v578_v23 = vadd.f32 %v3097_v27, %v577_v22  ;;  %v2688_v24 = vpop.f32.mrb[18].mxu0  ;;  %2717 = vmatprep.mubr.msk.bf16.mxu1 %vm672_vm0, %v711_v19 }
 0x11e   : > { %v658_v25 = vmax.f32 %v586_v21, 0.0  ;;  %v589_v26 = vadd.f32 %v2688_v24, %v3097_v27  ;;  %v580_v28 = vpop.f32.mrb[19].mxu0  ;;  %2718 = vmatmul.mubr.msk.bf16.gmra.mrb[12].mxu1 %vm672_vm0, %v712_v18 }
 0x11f   : > { %v656_v29 = vmax.f32 %v578_v23, 0.0  ;;  %v581_v30 = vadd.f32 %v3097_v27, %v580_v28 }
 0x120   : > { %691 = vst.msk [vmem:[#allocation2 + $0x90] sm:$0xff] %vm672_vm0, %v658_v25  ;;  %v659_v31 = vmax.f32 %v589_v26, 0.0 }
 0x121   : > { %689 = vst.msk [vmem:[#allocation2 + $0x80] sm:$0xff] %vm672_vm0, %v656_v29  ;;  %v657_v32 = vmax.f32 %v581_v30, 0.0 }
 0x122   : > { %692 = vst.msk [vmem:[#allocation2 + $0x98] sm:$0xff] %vm672_vm0, %v659_v31  ;;  %v714_v33 = vpack.c.bf16 %v659_v31, %v658_v25 }
 0x123   : > { %690 = vst.msk [vmem:[#allocation2 + $0x88] sm:$0xff] %vm672_vm0, %v657_v32  ;;  %v713_v34 = vpack.c.bf16 %v657_v32, %v656_v29  ;;  %v2691_v35 = vpop.f32.mrb[20].mxu0 }
 0x124   : > { %v602_v36 = vadd.f32 %v2691_v35, %v3097_v27  ;;  %v593_v37 = vpop.f32.mrb[21].mxu0 }
 0x125   : > { %v594_v38 = vadd.f32 %v3097_v27, %v593_v37  ;;  %v2692_v39 = vpop.f32.mrb[22].mxu0  ;;  %2721 = vmatprep.mubr.msk.bf16.mxu1 %vm672_vm0, %v713_v34 }
 0x126   : > { %v662_v40 = vmax.f32 %v602_v36, 0.0  ;;  %v605_v41 = vadd.f32 %v2692_v39, %v3097_v27  ;;  %v596_v42 = vpop.f32.mrb[23].mxu0  ;;  %2722 = vmatmul.mubr.msk.bf16.gmra.mrb[16].mxu1 %vm672_vm0, %v714_v33 }
 0x127   : > { %v660_v43 = vmax.f32 %v594_v38, 0.0  ;;  %v597_v44 = vadd.f32 %v3097_v27, %v596_v42 }
 0x128   : > { %695 = vst.msk [vmem:[#allocation2 + $0xb0] sm:$0xff] %vm672_vm0, %v662_v40  ;;  %v663_v45 = vmax.f32 %v605_v41, 0.0 }
 0x129   : > { %693 = vst.msk [vmem:[#allocation2 + $0xa0] sm:$0xff] %vm672_vm0, %v660_v43  ;;  %v661_v46 = vmax.f32 %v597_v44, 0.0 }
 0x12a   : > { %696 = vst.msk [vmem:[#allocation2 + $0xb8] sm:$0xff] %vm672_vm0, %v663_v45  ;;  %v716_v47 = vpack.c.bf16 %v663_v45, %v662_v40 }
 0x12b   : > { %694 = vst.msk [vmem:[#allocation2 + $0xa8] sm:$0xff] %vm672_vm0, %v661_v46  ;;  %v715_v48 = vpack.c.bf16 %v661_v46, %v660_v43  ;;  %v2695_v49 = vpop.f32.mrb[24].mxu0 }
 0x12c   : > { %v618_v50 = vadd.f32 %v2695_v49, %v3097_v27  ;;  %v609_v51 = vpop.f32.mrb[25].mxu0 }
 0x12d   : > { %v610_v52 = vadd.f32 %v3097_v27, %v609_v51  ;;  %v2696_v53 = vpop.f32.mrb[26].mxu0  ;;  %2725 = vmatprep.mubr.msk.bf16.mxu1 %vm672_vm0, %v715_v48 }
 0x12e   : > { %v666_v54 = vmax.f32 %v618_v50, 0.0  ;;  %v621_v55 = vadd.f32 %v2696_v53, %v3097_v27  ;;  %v612_v56 = vpop.f32.mrb[27].mxu0  ;;  %2726 = vmatmul.mubr.msk.bf16.gmra.mrb[20].mxu1 %vm672_vm0, %v716_v47 }
 0x12f   : > { %v664_v57 = vmax.f32 %v610_v52, 0.0  ;;  %v613_v58 = vadd.f32 %v3097_v27, %v612_v56 }
 0x130   : > { %699 = vst.msk [vmem:[#allocation2 + $0xd0] sm:$0xff] %vm672_vm0, %v666_v54  ;;  %v667_v59 = vmax.f32 %v621_v55, 0.0 }
 0x131   : > { %697 = vst.msk [vmem:[#allocation2 + $0xc0] sm:$0xff] %vm672_vm0, %v664_v57  ;;  %v665_v60 = vmax.f32 %v613_v58, 0.0 }
 0x132   : > { %700 = vst.msk [vmem:[#allocation2 + $0xd8] sm:$0xff] %vm672_vm0, %v667_v59  ;;  %v718_v61 = vpack.c.bf16 %v667_v59, %v666_v54 }
 0x133   : > { %698 = vst.msk [vmem:[#allocation2 + $0xc8] sm:$0xff] %vm672_vm0, %v665_v60  ;;  %v717_v62 = vpack.c.bf16 %v665_v60, %v664_v57  ;;  %v2699_v63 = vpop.f32.mrb[28].mxu0 }
 0x134   : > { %v634_v0 = vadd.f32 %v2699_v63, %v3097_v27  ;;  %v625_v1 = vpop.f32.mrb[29].mxu0 }
 0x135   : > { %v626_v2 = vadd.f32 %v3097_v27, %v625_v1  ;;  %v2700_v3 = vpop.f32.mrb[30].mxu0  ;;  %2729 = vmatprep.mubr.msk.bf16.mxu1 %vm672_vm0, %v717_v62 }
 0x136   : > { %v670_v4 = vmax.f32 %v634_v0, 0.0  ;;  %v637_v5 = vadd.f32 %v2700_v3, %v3097_v27  ;;  %v628_v6 = vpop.f32.mrb[31].mxu0  ;;  %2730 = vmatmul.mubr.msk.bf16.gmra.mrb[24].mxu1 %vm672_vm0, %v718_v61 }
 0x137   : > { %v668_v7 = vmax.f32 %v626_v2, 0.0  ;;  %v629_v8 = vadd.f32 %v3097_v27, %v628_v6  ;;  %v3182_v27 = vld [vmem:[%s3895_s4] ss:$0 sm:$0xff] }
 0x138   : > { %703 = vst.msk [vmem:[#allocation2 + $0xf0] sm:$0xff] %vm672_vm0, %v670_v4  ;;  %v671_v9 = vmax.f32 %v637_v5, 0.0 }
 0x139   : > { %701 = vst.msk [vmem:[#allocation2 + $0xe0] sm:$0xff] %vm672_vm0, %v668_v7  ;;  %v669_v10 = vmax.f32 %v629_v8, 0.0 }
 0x13a   : > { %704 = vst.msk [vmem:[#allocation2 + $0xf8] sm:$0xff] %vm672_vm0, %v671_v9  ;;  %v720_v11 = vpack.c.bf16 %v671_v9, %v670_v4 }
 0x13b   : > { %702 = vst.msk [vmem:[#allocation2 + $0xe8] sm:$0xff] %vm672_vm0, %v669_v10  ;;  %v719_v12 = vpack.c.bf16 %v669_v10, %v668_v7 }
 0x13d   : > { %2733 = vmatprep.mubr.msk.bf16.mxu1 %vm672_vm0, %v719_v12 }
 0x13e   : > { %2734 = vmatmul.mubr.msk.bf16.gmra.mrb[28].mxu1 %vm672_vm0, %v720_v11 }
 0x1d9   : > { %v2707_v13 = vpop.f32.mrb[0].mxu1 }
 0x1da   : > { %v826_v14 = vpop.f32.mrb[1].mxu1  ;;  %v835_v16 = vadd.f32 %v2707_v13, %v3182_v27 }
 0x1db   : > { %v2708_v15 = vpop.f32.mrb[2].mxu1  ;;  %v827_v19 = vadd.f32 %v3182_v27, %v826_v14 }
 0x1dc   : > { %v838_v17 = vadd.f32 %v2708_v15, %v3182_v27  ;;  %v829_v18 = vpop.f32.mrb[3].mxu1 }
 0x1dd   : > { %v830_v20 = vadd.f32 %v3182_v27, %v829_v18 }
 0x1de   : > { %v954_v21 = vpack.c.bf16 %v838_v17, %v835_v16 }
 0x1df   : > { %v953_v22 = vpack.c.bf16 %v830_v20, %v827_v19 }
 0x1e0   : > { %971 = vst.msk [vmem:[#allocation3 + $0x8] sm:$0xff] %vm969_vm1, %v954_v21 }
 0x1e1   : > { %970 = vst.msk [vmem:[#allocation3] sm:$0xff] %vm969_vm1, %v953_v22  ;;  %v2711_v23 = vpop.f32.mrb[4].mxu1 }
 0x1e2   : > { %v842_v24 = vpop.f32.mrb[5].mxu1  ;;  %v851_v26 = vadd.f32 %v2711_v23, %v3182_v27 }
 0x1e3   : > { %v2712_v25 = vpop.f32.mrb[6].mxu1  ;;  %v843_v30 = vadd.f32 %v3182_v27, %v842_v24 }
 0x1e4   : > { %v854_v28 = vadd.f32 %v2712_v25, %v3182_v27  ;;  %v845_v29 = vpop.f32.mrb[7].mxu1 }
 0x1e5   : > { %v846_v31 = vadd.f32 %v3182_v27, %v845_v29 }
 0x1e6   : > { %v956_v32 = vpack.c.bf16 %v854_v28, %v851_v26 }
 0x1e7   : > { %v3194_v33 = vld [vmem:[#allocation3 + $0x8] sm:$0xff]  ;;  %v955_v34 = vpack.c.bf16 %v846_v31, %v843_v30 }
 0x1e8   : > { %v3196_v35 = vld [vmem:[#allocation3] sm:$0xff]  ;;  %973 = vst.msk [vmem:[#allocation3 + $0x18] sm:$0xff] %vm969_vm1, %v956_v32 }
 0x1e9   : > { %972 = vst.msk [vmem:[#allocation3 + $0x10] sm:$0xff] %vm969_vm1, %v955_v34  ;;  %v2715_v36 = vpop.f32.mrb[8].mxu1 }
 0x1ea   : > { %v858_v37 = vpop.f32.mrb[9].mxu1  ;;  %v867_v39 = vadd.f32 %v2715_v36, %v3182_v27 }
 0x1eb   : > { %v2716_v38 = vpop.f32.mrb[10].mxu1  ;;  %v859_v42 = vadd.f32 %v3182_v27, %v858_v37 }
 0x1ec   : > { %v870_v40 = vadd.f32 %v2716_v38, %v3182_v27  ;;  %v861_v41 = vpop.f32.mrb[11].mxu1 }
 0x1ed   : > { %v862_v43 = vadd.f32 %v3182_v27, %v861_v41 }
 0x1ee   : > { %v958_v44 = vpack.c.bf16 %v870_v40, %v867_v39 }
 0x1ef   : > { %v3204_v45 = vld [vmem:[#allocation3 + $0x18] sm:$0xff]  ;;  %v957_v46 = vpack.c.bf16 %v862_v43, %v859_v42 }
 0x1f0   : > { %v3206_v47 = vld [vmem:[#allocation3 + $0x10] sm:$0xff]  ;;  %975 = vst.msk [vmem:[#allocation3 + $0x28] sm:$0xff] %vm969_vm1, %v958_v44 }
 0x1f1   : > { %974 = vst.msk [vmem:[#allocation3 + $0x20] sm:$0xff] %vm969_vm1, %v957_v46  ;;  %v2719_v48 = vpop.f32.mrb[12].mxu1 }
 0x1f2   : > { %v874_v49 = vpop.f32.mrb[13].mxu1  ;;  %v883_v51 = vadd.f32 %v2719_v48, %v3182_v27 }
 0x1f3   : > { %v2720_v50 = vpop.f32.mrb[14].mxu1  ;;  %v875_v54 = vadd.f32 %v3182_v27, %v874_v49 }
 0x1f4   : > { %v886_v52 = vadd.f32 %v2720_v50, %v3182_v27  ;;  %v877_v53 = vpop.f32.mrb[15].mxu1 }
 0x1f5   : > { %v878_v55 = vadd.f32 %v3182_v27, %v877_v53 }
 0x1f6   : > { %v960_v56 = vpack.c.bf16 %v886_v52, %v883_v51 }
 0x1f7   : > { %v3214_v57 = vld [vmem:[#allocation3 + $0x28] sm:$0xff]  ;;  %v959_v58 = vpack.c.bf16 %v878_v55, %v875_v54 }
 0x1f8   : > { %v3216_v59 = vld [vmem:[#allocation3 + $0x20] sm:$0xff]  ;;  %977 = vst.msk [vmem:[#allocation3 + $0x38] sm:$0xff] %vm969_vm1, %v960_v56 }
 0x1f9   : > { %976 = vst.msk [vmem:[#allocation3 + $0x30] sm:$0xff] %vm969_vm1, %v959_v58  ;;  %v2723_v60 = vpop.f32.mrb[16].mxu1 }
 0x1fa   : > { %v890_v61 = vpop.f32.mrb[17].mxu1  ;;  %v899_v63 = vadd.f32 %v2723_v60, %v3182_v27 }
 0x1fb   : > { %v2724_v62 = vpop.f32.mrb[18].mxu1  ;;  %v891_v2 = vadd.f32 %v3182_v27, %v890_v61 }
 0x1fc   : > { %v902_v0 = vadd.f32 %v2724_v62, %v3182_v27  ;;  %v893_v1 = vpop.f32.mrb[19].mxu1 }
 0x1fd   : > { %v894_v3 = vadd.f32 %v3182_v27, %v893_v1 }
 0x1fe   : > { %v962_v4 = vpack.c.bf16 %v902_v0, %v899_v63 }
 0x1ff   : > { %v3224_v5 = vld [vmem:[#allocation3 + $0x38] sm:$0xff]  ;;  %v961_v6 = vpack.c.bf16 %v894_v3, %v891_v2 }
 0x200   : > { %v3226_v7 = vld [vmem:[#allocation3 + $0x30] sm:$0xff]  ;;  %979 = vst.msk [vmem:[#allocation3 + $0x48] sm:$0xff] %vm969_vm1, %v962_v4 }
 0x201   : > { %978 = vst.msk [vmem:[#allocation3 + $0x40] sm:$0xff] %vm969_vm1, %v961_v6  ;;  %v2727_v8 = vpop.f32.mrb[20].mxu1 }
 0x202   : > { %v906_v9 = vpop.f32.mrb[21].mxu1  ;;  %v915_v11 = vadd.f32 %v2727_v8, %v3182_v27 }
 0x203   : > { %v2728_v10 = vpop.f32.mrb[22].mxu1  ;;  %v907_v14 = vadd.f32 %v3182_v27, %v906_v9 }
 0x204   : > { %v918_v12 = vadd.f32 %v2728_v10, %v3182_v27  ;;  %v909_v13 = vpop.f32.mrb[23].mxu1 }
 0x205   : > { %v910_v15 = vadd.f32 %v3182_v27, %v909_v13 }
 0x206   : > { %v964_v16 = vpack.c.bf16 %v918_v12, %v915_v11 }
 0x207   : > { %v3234_v17 = vld [vmem:[#allocation3 + $0x48] sm:$0xff]  ;;  %v963_v18 = vpack.c.bf16 %v910_v15, %v907_v14 }
 0x208   : > { %v3236_v19 = vld [vmem:[#allocation3 + $0x40] sm:$0xff]  ;;  %981 = vst.msk [vmem:[#allocation3 + $0x58] sm:$0xff] %vm969_vm1, %v964_v16 }
 0x209   : > { %980 = vst.msk [vmem:[#allocation3 + $0x50] sm:$0xff] %vm969_vm1, %v963_v18  ;;  %v2731_v20 = vpop.f32.mrb[24].mxu1 }
 0x20a   : > { %v922_v21 = vpop.f32.mrb[25].mxu1  ;;  %v931_v23 = vadd.f32 %v2731_v20, %v3182_v27 }
 0x20b   : > { %v2732_v22 = vpop.f32.mrb[26].mxu1  ;;  %v923_v26 = vadd.f32 %v3182_v27, %v922_v21 }
 0x20c   : > { %v934_v24 = vadd.f32 %v2732_v22, %v3182_v27  ;;  %v925_v25 = vpop.f32.mrb[27].mxu1 }
 0x20d   : > { %v926_v28 = vadd.f32 %v3182_v27, %v925_v25 }
 0x20e   : > { %v966_v29 = vpack.c.bf16 %v934_v24, %v931_v23 }
 0x20f   : > { %v3244_v30 = vld [vmem:[#allocation3 + $0x58] sm:$0xff]  ;;  %v965_v31 = vpack.c.bf16 %v926_v28, %v923_v26 }
 0x210   : > { %v3246_v32 = vld [vmem:[#allocation3 + $0x50] sm:$0xff]  ;;  %983 = vst.msk [vmem:[#allocation3 + $0x68] sm:$0xff] %vm969_vm1, %v966_v29 }
 0x211   : > { %982 = vst.msk [vmem:[#allocation3 + $0x60] sm:$0xff] %vm969_vm1, %v965_v31  ;;  %v2735_v34 = vpop.f32.mrb[28].mxu1 }
 0x212   : > { %v938_v36 = vpop.f32.mrb[29].mxu1  ;;  %v947_v38 = vadd.f32 %v2735_v34, %v3182_v27 }
 0x213   : > { %v2736_v37 = vpop.f32.mrb[30].mxu1  ;;  %v939_v41 = vadd.f32 %v3182_v27, %v938_v36 }
 0x214   : > { %v950_v39 = vadd.f32 %v2736_v37, %v3182_v27  ;;  %v941_v40 = vpop.f32.mrb[31].mxu1 }
 0x215   : > { %v942_v42 = vadd.f32 %v3182_v27, %v941_v40 }
 0x216   : > { %v968_v43 = vpack.c.bf16 %v950_v39, %v947_v38 }
 0x217   : > { %v3254_v44 = vld [vmem:[#allocation3 + $0x68] sm:$0xff]  ;;  %v967_v46 = vpack.c.bf16 %v942_v42, %v939_v41 }
 0x218   : > { %v3256_v48 = vld [vmem:[#allocation3 + $0x60] sm:$0xff]  ;;  %985 = vst.msk [vmem:[#allocation3 + $0x78] sm:$0xff] %vm969_vm1, %v968_v43 }
 0x219   : > { %984 = vst.msk [vmem:[#allocation3 + $0x70] sm:$0xff] %vm969_vm1, %v967_v46 }
 0x21f   : > { %v3260_v49 = vld [vmem:[#allocation3 + $0x78] sm:$0xff] }
 0x220   : > { %v3262_v50 = vld [vmem:[#allocation3 + $0x70] sm:$0xff] }
 0x221 LB: >> { %s2972_s14 = smov 96   ;;  %s2518_s15 = sshll.u32 %s2970_s13, 6  ;;  %s2970_s13 = sphi %s3264_s13, %s1007_s13  }
 0x222   : >> { %1033 = vrot.lane.b32.xlu0 %v3196_v35, %s2972_s14  ;;  %1035 = vrot.lane.b32.xlu1 %v3194_v33, %s2972_s14  ;;  %s1009_s16 = sshra.s32 %s2518_s15, 4  ;;  %s2973_s20 = smov 64  }
 0x223   : >> { %s2519_s18 = sshll.u32 %s1009_s16, 3  ;;  %s3436_s21 = scalar_lea.vmem [#allocation2], %s2518_s15 }
 0x224   : >> { %s3288_s19 = scalar_lea.vmem [#allocation3], %s2519_s18  ;;  %s1007_s13 = sadd.s32 1, %s2970_s13  }
 0x225   : >> { %v1013_v27 = vld [vmem:[%s3288_s19] sm:$0xff]  ;;  %v1014_v15 = vld [vmem:[%s3288_s19 + $0x8] sm:$0xff]  ;;  %v1015_v16 = vld [vmem:[%s3288_s19 + $0x10] sm:$0xff]  ;;  %p1004_p4 = scmp.ge.s32.totalorder %s1007_s13, 4  }
 0x226   : >> { %1049 = vrot.lane.b32.xlu0 %v3236_v19, %s2972_s14  ;;  %1051 = vrot.lane.b32.xlu1 %v3234_v17, %s2972_s14  ;;  %v1016_v18 = vld [vmem:[%s3288_s19 + $0x18] sm:$0xff]  ;;  %vm2047_vm2 = vcmask (%p1004_p4), 523520   ;;  %s2976_s24 = smov (%p1004_p4), 32   ;;  %vm2070_vm3 = vcmask (%p1004_p4), 1047808   ;;  %s2977_s25 = smov (%p1004_p4), 113   ;;  %vm2137_vm4 = vcmask (%p1004_p4), 924672  }
 0x227   : >> { %2587 = vmatprep.mubr.msk.bf16.mxu0 %vm672_vm0, %v1013_v27  ;;  %s2978_s27 = smov (%p1004_p4), 112   ;;  %s2979_s28 = smov (%p1004_p4), 111   ;;  %vm2197_vm7 = vcmask (%p1004_p4), 908288   ;;  %vm2167_vm8 = vcmask (%p1004_p4), 916480   ;;  %vm2227_vm10 = vcmask (%p1004_p4), 793600   ;;  %vm2284_vm12 = vcmask (%p1004_p4), 777216  }
 0x228   : > { %s2980_s29 = smov (%p1004_p4), 97   ;;  %s2981_s6 = smov (%p1004_p4), 96   ;;  %vm2314_vm13 = vcmask (%p1004_p4), 662528   ;;  %vm2344_vm14 = vcmask (%p1004_p4), 654336   ;;  %vm2372_vm15 = vcmask (%p1004_p4), 646144  }
 0x229   : > { %s2982_s30 = smov (%p1004_p4), 95   ;;  %s2983_s8 = smov (%p1004_p4), 81  }
 0x22a   : >> { %1053 = vrot.lane.b32.xlu1 %v3246_v32, %s2972_s14  ;;  %1037 = vrot.lane.b32.xlu0 %v3206_v47, %s2972_s14  ;;  %s2984_s9 = smov (%p1004_p4), 80   ;;  %s2985_s10 = smov (%p1004_p4), 79  }
 0x22e   : >> { %1055 = vrot.lane.b32.xlu1 %v3244_v30, %s2972_s14  ;;  %1039 = vrot.lane.b32.xlu0 %v3204_v45, %s2972_s14 }
 0x232   : >> { %1057 = vrot.lane.b32.xlu1 %v3256_v48, %s2972_s14  ;;  %1041 = vrot.lane.b32.xlu0 %v3216_v59, %s2972_s14 }
 0x236   : >> { %1059 = vrot.lane.b32.xlu1 %v3254_v44, %s2972_s14  ;;  %1043 = vrot.lane.b32.xlu0 %v3214_v57, %s2972_s14 }
 0x23a   : >> { %1061 = vrot.lane.b32.xlu1 %v3262_v50, %s2972_s14  ;;  %1045 = vrot.lane.b32.xlu0 %v3226_v7, %s2972_s14 }
 0x23e   : >> { %1063 = vrot.lane.b32.xlu1 %v3260_v49, %s2972_s14  ;;  %1047 = vrot.lane.b32.xlu0 %v3224_v5, %s2972_s14 }
 0x242   : >> { %1342 = vrot.lane.b32.xlu1 %v3236_v19, %s2973_s20  ;;  %1326 = vrot.lane.b32.xlu0 %v3196_v35, %s2973_s20 }
 0x246   : >> { %1344 = vrot.lane.b32.xlu1 %v3234_v17, %s2973_s20  ;;  %1328 = vrot.lane.b32.xlu0 %v3194_v33, %s2973_s20 }
 0x24a   : >> { %1346 = vrot.lane.b32.xlu1 %v3246_v32, %s2973_s20  ;;  %1348 = vrot.lane.b32.xlu0 %v3244_v30, %s2973_s20 }
 0x24e   : >> { %1330 = vrot.lane.b32.xlu1 %v3206_v47, %s2973_s20  ;;  %1350 = vrot.lane.b32.xlu0 %v3256_v48, %s2973_s20 }
 0x252   : >> { %1332 = vrot.lane.b32.xlu1 %v3204_v45, %s2973_s20 }
 0x256   : >> { %1334 = vrot.lane.b32.xlu1 %v3216_v59, %s2973_s20 }
 0x294   : >> { %v1034_v51 = vpop.permute.xlu0 %1033  ;;  %v1036_v52 = vpop.permute.xlu1 %1035 }
 0x295   : >> { %v1078_v55 = vsel %vm672_vm0, %v1034_v51, 0  ;;  %v1081_v58 = vsel %vm672_vm0, %v1036_v52, 0 }
 0x298   : >> { %v1050_v53 = vpop.permute.xlu0 %1049  ;;  %v1052_v54 = vpop.permute.xlu1 %1051 }
 0x299   : >> { %2737 = vmatprep.subr.msk.bf16.mxu0 %vm672_vm0, %v1050_v53 }
 0x29a   : >> { %2572 = vmatpush3.bf16.xpose.msra.mxu0 %v1078_v55 }
 0x29b   : >> { %2738 = vmatprep.subr.msk.bf16.mxu0 %vm672_vm0, %v1052_v54 }
 0x29c   : >> { %v1054_v56 = vpop.permute.xlu1 %1053  ;;  %v1038_v60 = vpop.permute.xlu0 %1037 }
 0x29d   : >> { %v1084_v61 = vsel %vm672_vm0, %v1038_v60, 0 }
 0x2a0   : >> { %v1056_v62 = vpop.permute.xlu1 %1055  ;;  %v1040_v63 = vpop.permute.xlu0 %1039 }
 0x2a1   : >> { %v1087_v0 = vsel %vm672_vm0, %v1040_v63, 0 }
 0x2a2   : >> { %2574 = vmatpush3.bf16.xpose.msra.mxu0 %v1081_v58 }
 0x2a3   : >> { %2739 = vmatprep.subr.msk.bf16.mxu0 %vm672_vm0, %v1054_v56 }
 0x2a4   : >> { %v1058_v1 = vpop.permute.xlu1 %1057  ;;  %v1042_v2 = vpop.permute.xlu0 %1041 }
 0x2a5   : >> { %v1090_v3 = vsel %vm672_vm0, %v1042_v2, 0 }
 0x2a8   : >> { %v1060_v4 = vpop.permute.xlu1 %1059  ;;  %v1044_v6 = vpop.permute.xlu0 %1043 }
 0x2a9   : >> { %v1093_v8 = vsel %vm672_vm0, %v1044_v6, 0 }
 0x2aa   : >> { %2576 = vmatpush3.bf16.xpose.msra.mxu0 %v1084_v61 }
 0x2ab   : >> { %2740 = vmatprep.subr.msk.bf16.mxu0 %vm672_vm0, %v1056_v62 }
 0x2ac   : >> { %v1062_v9 = vpop.permute.xlu1 %1061  ;;  %v1046_v10 = vpop.permute.xlu0 %1045 }
 0x2ad   : >> { %v1096_v11 = vsel %vm672_vm0, %v1046_v10, 0 }
 0x2b0   : >> { %v1064_v12 = vpop.permute.xlu1 %1063  ;;  %v1048_v13 = vpop.permute.xlu0 %1047 }
 0x2b1   : >> { %v1099_v14 = vsel %vm672_vm0, %v1048_v13, 0 }
 0x2b2   : >> { %2578 = vmatpush3.bf16.xpose.msra.mxu0 %v1087_v0 }
 0x2b3   : >> { %2741 = vmatprep.subr.msk.bf16.mxu0 %vm672_vm0, %v1058_v1 }
 0x2b4   : >> { %v1343_v20 = vpop.permute.xlu1 %1342  ;;  %v1327_v21 = vpop.permute.xlu0 %1326 }
 0x2b5   : >> { %2595 = vmatprep.subr.bf16.mxu1 %v1343_v20 }
 0x2b6   : >> { %2596 = vmatpush3.bf16.msra.mxu1 %v1327_v21 }
 0x2b8   : >> { %v1345_v22 = vpop.permute.xlu1 %1344  ;;  %v1329_v23 = vpop.permute.xlu0 %1328 }
 0x2b9   : >> { %2597 = vmatprep.subr.bf16.mxu1 %v1345_v22 }
 0x2ba   : >> { %2580 = vmatpush3.bf16.xpose.msra.mxu0 %v1090_v3  ;;  %2598 = vmatpush3.bf16.msra.mxu1 %v1329_v23 }
 0x2bb   : >> { %2742 = vmatprep.subr.msk.bf16.mxu0 %vm672_vm0, %v1060_v4 }
 0x2bc   : >> { %v1347_v24 = vpop.permute.xlu1 %1346  ;;  %v1349_v26 = vpop.permute.xlu0 %1348 }
 0x2bd   : >> { %2599 = vmatprep.subr.bf16.mxu1 %v1347_v24 }
 0x2c0   : >> { %v1331_v25 = vpop.permute.xlu1 %1330  ;;  %v1351_v29 = vpop.permute.xlu0 %1350 }
 0x2c1   : >> { %2600 = vmatpush3.bf16.msra.mxu1 %v1331_v25 }
 0x2c2   : >> { %2582 = vmatpush3.bf16.xpose.msra.mxu0 %v1093_v8  ;;  %2601 = vmatprep.subr.bf16.mxu1 %v1349_v26 }
 0x2c3   : >> { %2743 = vmatprep.subr.msk.bf16.mxu0 %vm672_vm0, %v1062_v9 }
 0x2c4   : >> { %v1333_v28 = vpop.permute.xlu1 %1332 }
 0x2c5   : >> { %2602 = vmatpush3.bf16.msra.mxu1 %v1333_v28 }
 0x2c6   : >> { %2603 = vmatprep.subr.bf16.mxu1 %v1351_v29 }
 0x2c8   : >> { %v1335_v31 = vpop.permute.xlu1 %1334 }
 0x2c9   : >> { %2604 = vmatpush3.bf16.msra.mxu1 %v1335_v31 }
 0x2ca   : >> { %2584 = vmatpush3.bf16.xpose.msra.mxu0 %v1096_v11 }
 0x2cb   : >> { %2744 = vmatprep.subr.msk.bf16.mxu0 %vm672_vm0, %v1064_v12 }
 0x2d2   : >> { %2586 = vmatpush3.bf16.xpose.msra.mxu0 %v1099_v14 }
 0x2d9   : >> { %2588 = vmatmul.mubr.msk.bf16.vlgmr.msra.gmra.mrb[0].mxu0 %vm672_vm0, %v1013_v27 }
 0x2da   : >> { %2589 = vmatprep.mubr.msk.bf16.mxu0 %vm672_vm0, %v1014_v15 }
 0x2e1   : >> { %2590 = vmatmul.mubr.msk.bf16.gmra.mrb[4].mxu0 %vm672_vm0, %v1014_v15 }
 0x2e2   : >> { %2591 = vmatprep.mubr.msk.bf16.mxu0 %vm672_vm0, %v1015_v16 }
 0x2e9   : >> { %2592 = vmatmul.mubr.msk.bf16.gmra.mrb[8].mxu0 %vm672_vm0, %v1015_v16 }
 0x2ea   : >> { %2593 = vmatprep.mubr.msk.bf16.mxu0 %vm672_vm0, %v1016_v18 }
 0x2f1   : >> { %2594 = vmatmul.mubr.msk.bf16.gmra.mrb[12].mxu0 %vm672_vm0, %v1016_v18 }
 0x3ac   : >> { %v1159_v34 = vpop.f32.mrb[0].mxu0 }
 0x3ad   : >> { %v1161_v36 = vpop.f32.mrb[1].mxu0 }
 0x3ae   : >> { %v1163_v37 = vpop.f32.mrb[2].mxu0  ;;  %v1198_v38 = vmax.f32 %v1159_v34, %v1161_v36 }
 0x3af   : >> { %v1165_v39 = vpop.f32.mrb[3].mxu0 }
 0x3b0   : >> { %1199 = vmax.xlane.f32.xlu0 %v1198_v38  ;;  %v1201_v40 = vmax.f32 %v1163_v37, %v1165_v39 }
 0x3b2   : >> { %1202 = vmax.xlane.f32.xlu1 %v1201_v40 }
 0x3b4   : >> { %v1169_v41 = vpop.f32.mrb[4].mxu0 }
 0x3b5   : >> { %v1171_v42 = vpop.f32.mrb[5].mxu0 }
 0x3b6   : >> { %v1173_v43 = vpop.f32.mrb[6].mxu0  ;;  %v1204_v46 = vmax.f32 %v1169_v41, %v1171_v42 }
 0x3b7   : >> { %v1175_v27 = vpop.f32.mrb[7].mxu0 }
 0x3b8   : >> { %1205 = vmax.xlane.f32.xlu0 %v1204_v46  ;;  %v1207_v51 = vmax.f32 %v1173_v43, %v1175_v27 }
 0x3bc   : >> { %1208 = vmax.xlane.f32.xlu0 %v1207_v51  ;;  %v3338_v52 = vpop.f32.mrb[8].mxu0 }
 0x3bd   : >> { %v3340_v53 = vpop.f32.mrb[9].mxu0 }
 0x3be   : >> { %v3342_v54 = vpop.f32.mrb[10].mxu0  ;;  %v1210_v55 = vmax.f32 %v3338_v52, %v3340_v53 }
 0x3bf   : >> { %v3346_v56 = vpop.f32.mrb[11].mxu0 }
 0x3c0   : >> { %v1213_v58 = vmax.f32 %v3342_v54, %v3346_v56 }
 0x3c3   : >> { %1336 = vrot.lane.b32.xlu1 %v3214_v57, %s2973_s20 }
 0x3c4   : >> { %v3352_v60 = vpop.f32.mrb[12].mxu0 }
 0x3c5   : >> { %v3354_v61 = vpop.f32.mrb[13].mxu0 }
 0x3c6   : >> { %v1216_v62 = vmax.f32 %v3352_v60, %v3354_v61  ;;  %v3358_v63 = vpop.f32.mrb[14].mxu0 }
 0x3c7   : >> { %v3360_v0 = vpop.f32.mrb[15].mxu0 }
 0x3c8   : >> { %v1219_v1 = vmax.f32 %v3358_v63, %v3360_v0 }
 0x3d2   : >> { %1352 = vrot.lane.b32.xlu0 %v3254_v44, %s2973_s20 }
 0x3e7   : >> { %1211 = vmax.xlane.f32.xlu1 %v1210_v55 }
 0x3eb   : >> { %1217 = vmax.xlane.f32.xlu1 %v1216_v62 }
 0x3f1   : >> { %1214 = vmax.xlane.f32.xlu0 %v1213_v58 }
 0x3f5   : >> { %1220 = vmax.xlane.f32.xlu0 %v1219_v1 }
 0x3fc   : >> { %1338 = vrot.lane.b32.xlu1 %v3226_v7, %s2973_s20 }
 0x40b   : >> { %1354 = vrot.lane.b32.xlu0 %v3262_v50, %s2973_s20 }
 0x43d   : >> { %v1200_v2 = vpop.xlane.xlu0 %1199 }
 0x43e   : >> { %v1222_v3 = vsub.f32 %v1159_v34, %v1200_v2  ;;  %v1223_v4 = vsub.f32 %v1161_v36, %v1200_v2 }
 0x43f   : >> { %v1203_v6 = vpop.xlane.xlu1 %1202 }
 0x440   : >> { %v1238_v8 = vmul.f32 1.442695, %v1222_v3  ;;  %v1240_v9 = vmul.f32 1.442695, %v1223_v4  ;;  %v1224_v10 = vsub.f32 %v1163_v37, %v1203_v6  ;;  %v1225_v11 = vsub.f32 %v1165_v39, %v1203_v6 }
 0x442   : >> { %2810 = vpow2.f32 %v1238_v8  ;;  %v1242_v12 = vmul.f32 1.442695, %v1224_v10  ;;  %v1244_v13 = vmul.f32 1.442695, %v1225_v11 }
 0x443   : >> { %2812 = vpow2.f32 %v1240_v9  ;;  %v1337_v34 = vpop.permute.xlu1 %1336 }
 0x444   : >> { %2814 = vpow2.f32 %v1242_v12 }
 0x445   : >> { %2816 = vpow2.f32 %v1244_v13  ;;  %v1206_v14 = vpop.xlane.xlu0 %1205 }
 0x446   : >> { %v1226_v15 = vsub.f32 %v1169_v41, %v1206_v14  ;;  %v1227_v16 = vsub.f32 %v1171_v42, %v1206_v14 }
 0x448   : >> { %v1246_v18 = vmul.f32 1.442695, %v1226_v15  ;;  %v1248_v20 = vmul.f32 1.442695, %v1227_v16 }
 0x449   : >> { %v1209_v21 = vpop.xlane.xlu0 %1208 }
 0x44a   : >> { %2818 = vpow2.f32 %v1246_v18  ;;  %v1228_v22 = vsub.f32 %v1173_v43, %v1209_v21  ;;  %v1229_v23 = vsub.f32 %v1175_v27, %v1209_v21 }
 0x44b   : >> { %2820 = vpow2.f32 %v1248_v20 }
 0x44c   : >> { %v3370_v24 = vpop.eup %2810  ;;  %v1250_v25 = vmul.f32 1.442695, %v1228_v22  ;;  %v1252_v26 = vmul.f32 1.442695, %v1229_v23 }
 0x44d   : >> { %v3372_v28 = vpop.eup %2812  ;;  %v1353_v29 = vpop.permute.xlu0 %1352 }
 0x44e   : >> { %v3374_v31 = vpop.eup %2814  ;;  %2822 = vpow2.f32 %v1250_v25  ;;  %2605 = vmatprep.subr.bf16.mxu1 %v1353_v29  ;;  %v1270_v36 = vadd.f32 %v3372_v28, %v3370_v24 }
 0x44f   : >> { %v3378_v37 = vpop.eup %2816  ;;  %2824 = vpow2.f32 %v1252_v26  ;;  %2606 = vmatpush3.bf16.msra.mxu1 %v1337_v34 }
 0x450   : >> { %1271 = vadd.xlane.f32.xlu1 %v1270_v36  ;;  %v1273_v38 = vadd.f32 %v3378_v37, %v3374_v31 }
 0x452   : >> { %1274 = vadd.xlane.f32.xlu0 %v1273_v38 }
 0x454   : >> { %v3382_v39 = vpop.eup %2818 }
 0x455   : >> { %v3384_v40 = vpop.eup %2820 }
 0x456   : >> { %v1276_v41 = vadd.f32 %v3384_v40, %v3382_v39 }
 0x458   : >> { %v3388_v42 = vpop.eup %2822  ;;  %1277 = vadd.xlane.f32.xlu0 %v1276_v41 }
 0x459   : >> { %v3390_v43 = vpop.eup %2824 }
 0x45a   : >> { %v1279_v46 = vadd.f32 %v3390_v43, %v3388_v42 }
 0x45c   : >> { %1280 = vadd.xlane.f32.xlu1 %v1279_v46 }
 0x474   : >> { %v1212_v27 = vpop.xlane.xlu1 %1211 }
 0x475   : >> { %v1230_v51 = vsub.f32 %v3338_v52, %v1212_v27  ;;  %v1231_v55 = vsub.f32 %v3340_v53, %v1212_v27 }
 0x477   : >> { %v1254_v58 = vmul.f32 1.442695, %v1230_v51  ;;  %v1256_v62 = vmul.f32 1.442695, %v1231_v55 }
 0x478   : >> { %v1218_v1 = vpop.xlane.xlu1 %1217 }
 0x479   : >> { %2826 = vpow2.f32 %v1254_v58  ;;  %v1234_v2 = vsub.f32 %v3352_v60, %v1218_v1  ;;  %v1235_v3 = vsub.f32 %v3354_v61, %v1218_v1 }
 0x47a   : >> { %2828 = vpow2.f32 %v1256_v62 }
 0x47b   : >> { %v1262_v4 = vmul.f32 1.442695, %v1234_v2  ;;  %v1264_v6 = vmul.f32 1.442695, %v1235_v3 }
 0x47c   : >> { %v1339_v16 = vpop.permute.xlu1 %1338 }
 0x47d   : >> { %2830 = vpow2.f32 %v1262_v4 }
 0x47e   : >> { %2832 = vpow2.f32 %v1264_v6  ;;  %v1215_v8 = vpop.xlane.xlu0 %1214 }
 0x47f   : >> { %v1232_v9 = vsub.f32 %v3342_v54, %v1215_v8  ;;  %v1233_v52 = vsub.f32 %v3346_v56, %v1215_v8 }
 0x481   : >> { %v1258_v10 = vmul.f32 1.442695, %v1232_v9  ;;  %v1260_v53 = vmul.f32 1.442695, %v1233_v52 }
 0x482   : >> { %v1221_v11 = vpop.xlane.xlu0 %1220 }
 0x483   : >> { %v3400_v12 = vpop.eup %2826  ;;  %2834 = vpow2.f32 %v1258_v10  ;;  %v1236_v60 = vsub.f32 %v3358_v63, %v1221_v11  ;;  %v1237_v61 = vsub.f32 %v3360_v0, %v1221_v11 }
 0x484   : >> { %v3404_v13 = vpop.eup %2828  ;;  %2836 = vpow2.f32 %v1260_v53 }
 0x485   : >> { %v1266_v14 = vmul.f32 1.442695, %v1236_v60  ;;  %v1268_v15 = vmul.f32 1.442695, %v1237_v61  ;;  %v1282_v54 = vadd.f32 %v3404_v13, %v3400_v12 }
 0x486   : >> { %v1355_v56 = vpop.permute.xlu0 %1354 }
 0x487   : >> { %v3408_v18 = vpop.eup %2830  ;;  %2838 = vpow2.f32 %v1266_v14  ;;  %1283 = vadd.xlane.f32.xlu0 %v1282_v54  ;;  %2607 = vmatprep.subr.bf16.mxu1 %v1355_v56 }
 0x488   : >> { %v3410_v20 = vpop.eup %2832  ;;  %2840 = vpow2.f32 %v1268_v15  ;;  %2608 = vmatpush3.bf16.msra.mxu1 %v1339_v16 }
 0x489   : >> { %v1288_v63 = vadd.f32 %v3410_v20, %v3408_v18 }
 0x48b   : >> { %1289 = vadd.xlane.f32.xlu0 %v1288_v63 }
 0x48d   : >> { %v2835_v0 = vpop.eup %2834 }
 0x48e   : >> { %v2837_v21 = vpop.eup %2836 }
 0x48f   : >> { %v1285_v22 = vadd.f32 %v2837_v21, %v2835_v0 }
 0x491   : >> { %v3414_v23 = vpop.eup %2838  ;;  %1286 = vadd.xlane.f32.xlu1 %v1285_v22 }
 0x492   : >> { %v2841_v25 = vpop.eup %2840 }
 0x493   : >> { %v1291_v26 = vadd.f32 %v2841_v25, %v3414_v23 }
 0x495   : >> { %1292 = vadd.xlane.f32.xlu1 %v1291_v26 }
 0x4a1   : >> { %1356 = vrot.lane.b32.xlu0 %v3260_v49, %s2973_s20 }
 0x4a6   : >> { %1340 = vrot.lane.b32.xlu1 %v3224_v5, %s2973_s20 }
 0x4dd   : >> { %v1272_v29 = vpop.xlane.xlu1 %1271 }
 0x4de   : >> { %2842 = vrcp.f32 %v1272_v29 }
 0x4df   : >> { %v1275_v34 = vpop.xlane.xlu0 %1274 }
 0x4e0   : >> { %2844 = vrcp.f32 %v1275_v34 }
 0x4e5   : >> { %v1278_v62 = vpop.xlane.xlu0 %1277 }
 0x4e8   : >> { %v2843_v36 = vpop.eup %2842 }
 0x4e9   : >> { %v1303_v41 = vmul.f32 %v2843_v36, %v3372_v28  ;;  %v1302_v27 = vmul.f32 %v2843_v36, %v3370_v24  ;;  %v1281_v2 = vpop.xlane.xlu1 %1280 }
 0x4ea   : >> { %v2845_v38 = vpop.eup %2844  ;;  %2846 = vrcp.f32 %v1281_v2 }
 0x4eb   : >> { %v1305_v46 = vmul.f32 %v2845_v38, %v3378_v37  ;;  %v1304_v51 = vmul.f32 %v2845_v38, %v3374_v31  ;;  %2848 = vrcp.f32 %v1278_v62  ;;  %v1443_v62 = vld [vmem:[%s3436_s21 + $0x18] sm:$0xff] }
 0x4ed   : >> { %v1319_v55 = vpack.c.bf16 %v1305_v46, %v1303_v41  ;;  %v1318_v58 = vpack.c.bf16 %v1304_v51, %v1302_v27  ;;  %v1442_v27 = vld [vmem:[%s3436_s21 + $0x10] sm:$0xff] }
 0x4ef   : >> { %1406 = vmatprep.mubr.bf16.mxu1 %v1319_v55 }
 0x4f4   : >> { %v2847_v28 = vpop.eup %2846 }
 0x4f5   : >> { %v2849_v8 = vpop.eup %2848  ;;  %v1309_v24 = vmul.f32 %v2847_v28, %v3390_v43  ;;  %v1308_v11 = vmul.f32 %v2847_v28, %v3388_v42  ;;  %v1444_v28 = vld [vmem:[%s3436_s21 + $0x20] sm:$0xff] }
 0x4f6   : >> { %v1307_v9 = vmul.f32 %v2849_v8, %v3384_v40  ;;  %v1306_v61 = vmul.f32 %v2849_v8, %v3382_v39 }
 0x4f8   : >> { %v1321_v52 = vpack.c.bf16 %v1309_v24, %v1307_v9  ;;  %v1320_v15 = vpack.c.bf16 %v1308_v11, %v1306_v61 }
 0x514   : >> { %v1284_v1 = vpop.xlane.xlu0 %1283 }
 0x518   : >> { %v1290_v3 = vpop.xlane.xlu0 %1289 }
 0x51c   : >> { %v1357_v4 = vpop.permute.xlu0 %1356 }
 0x51d   : >> { %2609 = vmatprep.subr.bf16.mxu1 %v1357_v4 }
 0x51e   : >> { %v1287_v6 = vpop.xlane.xlu1 %1286 }
 0x51f   : >> { %2850 = vrcp.f32 %v1287_v6 }
 0x520   : >> { %2852 = vrcp.f32 %v1284_v1 }
 0x522   : >> { %v1293_v37 = vpop.xlane.xlu1 %1292 }
 0x523   : >> { %2854 = vrcp.f32 %v1293_v37 }
 0x524   : >> { %2856 = vrcp.f32 %v1290_v3 }
 0x526   : >> { %v1341_v31 = vpop.permute.xlu1 %1340 }
 0x527   : >> { %2610 = vmatpush3.bf16.msra.mxu1 %v1341_v31  ;;  %v1445_v31 = vld [vmem:[%s3436_s21 + $0x28] sm:$0xff] }
 0x529   : >> { %v2851_v10 = vpop.eup %2850 }
 0x52a   : >> { %1407 = vmatmul.mubr.bf16.vlgmr.msra.gmra.mrb[0].mxu1 %v1318_v58  ;;  %v2853_v53 = vpop.eup %2852  ;;  %v1313_v60 = vmul.f32 %v2851_v10, %v2837_v21  ;;  %v1312_v16 = vmul.f32 %v2851_v10, %v2835_v0 }
 0x52b   : >> { %1414 = vmatprep.mubr.bf16.mxu1 %v1321_v52  ;;  %v1311_v14 = vmul.f32 %v2853_v53, %v3404_v13  ;;  %v1310_v63 = vmul.f32 %v2853_v53, %v3400_v12  ;;  %v1440_v12 = vld [vmem:[%s3436_s21] sm:$0xff] }
 0x52d   : >> { %v1323_v43 = vpack.c.bf16 %v1313_v60, %v1311_v14  ;;  %v2855_v54 = vpop.eup %2854  ;;  %v1322_v26 = vpack.c.bf16 %v1312_v16, %v1310_v63  ;;  %v1446_v60 = vld [vmem:[%s3436_s21 + $0x30] sm:$0xff] }
 0x52e   : >> { %v2857_v40 = vpop.eup %2856  ;;  %v1317_v56 = vmul.f32 %v2855_v54, %v2841_v25  ;;  %v1316_v39 = vmul.f32 %v2855_v54, %v3414_v23  ;;  %v1441_v23 = vld [vmem:[%s3436_s21 + $0x8] sm:$0xff] }
 0x52f   : >> { %v1315_v22 = vmul.f32 %v2857_v40, %v3410_v20  ;;  %v1314_v13 = vmul.f32 %v2857_v40, %v3408_v18 }
 0x531   : >> { %v1325_v42 = vpack.c.bf16 %v1317_v56, %v1315_v22  ;;  %v1324_v21 = vpack.c.bf16 %v1316_v39, %v1314_v13 }
 0x532   : >> { %1415 = vmatmul.mubr.bf16.gmra.mrb[4].mxu1 %v1320_v15 }
 0x533   : >> { %1422 = vmatprep.mubr.bf16.mxu1 %v1323_v43  ;;  %v1447_v43 = vld [vmem:[%s3436_s21 + $0x38] sm:$0xff] }
 0x53a   : >> { %1423 = vmatmul.mubr.bf16.gmra.mrb[8].mxu1 %v1322_v26 }
 0x53b   : >> { %1430 = vmatprep.mubr.bf16.mxu1 %v1325_v42 }
 0x542   : >> { %1431 = vmatmul.mubr.bf16.gmra.mrb[12].mxu1 %v1324_v21 }
 0x5fd   : >> { %v2611_v29 = vpop.f32.mrb[0].mxu1 }
 0x5fe   : >> { %v2612_v34 = vpop.f32.mrb[1].mxu1 }
 0x5ff   : >> { %v2613_v20 = vadd.f32 %v2612_v34, %v2611_v29  ;;  %v2614_v0 = vpop.f32.mrb[2].mxu1 }
 0x600   : >> { %v2615_v25 = vpop.f32.mrb[3].mxu1 }
 0x601   : >> { %v1448_v18 = vadd.f32 %v2613_v20, %v1440_v12  ;;  %v2616_v36 = vadd.f32 %v2615_v25, %v2614_v0 }
 0x603   : >> { %1456 = vst.msk [vmem:[%s3436_s21] sm:$0xff] %vm672_vm0, %v1448_v18  ;;  %v1449_v38 = vadd.f32 %v2616_v36, %v1441_v23 }
 0x605   : >> { %1457 = vst.msk [vmem:[%s3436_s21 + $0x8] sm:$0xff] %vm672_vm0, %v1449_v38  ;;  %v2617_v41 = vpop.f32.mrb[4].mxu1 }
 0x606   : >> { %v2618_v46 = vpop.f32.mrb[5].mxu1 }
 0x607   : >> { %v2619_v51 = vadd.f32 %v2618_v46, %v2617_v41  ;;  %v2620_v55 = vpop.f32.mrb[6].mxu1 }
 0x608   : >> { %v2621_v58 = vpop.f32.mrb[7].mxu1 }
 0x609   : >> { %v1450_v1 = vadd.f32 %v2619_v51, %v1442_v27  ;;  %v2622_v2 = vadd.f32 %v2621_v58, %v2620_v55 }
 0x60b   : >> { %1458 = vst.msk [vmem:[%s3436_s21 + $0x10] sm:$0xff] %vm672_vm0, %v1450_v1  ;;  %v1451_v3 = vadd.f32 %v2622_v2, %v1443_v62 }
 0x60d   : >> { %1459 = vst.msk [vmem:[%s3436_s21 + $0x18] sm:$0xff] %vm672_vm0, %v1451_v3  ;;  %v2623_v4 = vpop.f32.mrb[8].mxu1 }
 0x60e   : >> { %v2624_v6 = vpop.f32.mrb[9].mxu1 }
 0x60f   : >> { %v2625_v37 = vadd.f32 %v2624_v6, %v2623_v4  ;;  %v2626_v8 = vpop.f32.mrb[10].mxu1 }
 0x610   : >> { %v2627_v24 = vpop.f32.mrb[11].mxu1 }
 0x611   : >> { %v1452_v9 = vadd.f32 %v2625_v37, %v1444_v28  ;;  %v2628_v52 = vadd.f32 %v2627_v24, %v2626_v8 }
 0x613   : >> { %1460 = vst.msk [vmem:[%s3436_s21 + $0x20] sm:$0xff] %vm672_vm0, %v1452_v9  ;;  %v1453_v10 = vadd.f32 %v2628_v52, %v1445_v31 }
 0x615   : >> { %1461 = vst.msk [vmem:[%s3436_s21 + $0x28] sm:$0xff] %vm672_vm0, %v1453_v10  ;;  %v2629_v53 = vpop.f32.mrb[12].mxu1 }
 0x616   : >> { %v2630_v11 = vpop.f32.mrb[13].mxu1 }
 0x617   : >> { %v2631_v61 = vadd.f32 %v2630_v11, %v2629_v53  ;;  %v2632_v14 = vpop.f32.mrb[14].mxu1  ;;  %1006 = sbr.rel (!%p1004_p4) target bundleno = 545 (0x221), region = 95 }
 0x618   : >> { %v2633_v15 = vpop.f32.mrb[15].mxu1 }
 0x619   : >> { %v1454_v54 = vadd.f32 %v2631_v61, %v1446_v60  ;;  %v2634_v40 = vadd.f32 %v2633_v15, %v2632_v14 }
 0x61b   : >> { %1462 = vst.msk [vmem:[%s3436_s21 + $0x30] sm:$0xff] %vm672_vm0, %v1454_v54  ;;  %v1455_v16 = vadd.f32 %v2634_v40, %v1447_v43 }
 0x61d   : >> { %1463 = vst.msk [vmem:[%s3436_s21 + $0x38] sm:$0xff] %vm672_vm0, %v1455_v16 }
 0x624   : > { %v3465_v56 = vld [vmem:[#allocation2 + $0x80] sm:$0xff]  ;;  %v3467_v63 = vld [vmem:[#allocation2 + $0x88] sm:$0xff]  ;;  %v3479_v21 = vld [vmem:[#allocation2 + $0x90] sm:$0xff] }
 0x625   : > { %v3469_v22 = vld [vmem:[#allocation2] sm:$0xff]  ;;  %v1568_v26 = vsel %vm672_vm0, %v3465_v56, -inf  ;;  %v1569_v42 = vsel %vm672_vm0, %v3467_v63, -inf  ;;  %v3475_v39 = vld [vmem:[#allocation2 + $0x8] sm:$0xff]  ;;  %v3481_v29 = vld [vmem:[#allocation2 + $0x98] sm:$0xff]  ;;  %v1577_v45 = vsel %vm672_vm0, %v3479_v21, -inf }
 0x626   : > { %v1496_v13 = vsel %vm672_vm0, %v3469_v22, -inf  ;;  %v1570_v33 = vmax.f32 %v1568_v26, %v1569_v42  ;;  %v1497_v35 = vsel %vm672_vm0, %v3475_v39, -inf  ;;  %v1578_v47 = vsel %vm672_vm0, %v3481_v29, -inf  ;;  %v3489_v57 = vld [vmem:[#allocation2 + $0x10] sm:$0xff]  ;;  %v3491_v59 = vld [vmem:[#allocation2 + $0x18] sm:$0xff]  ;;  %v3493_v5 = vld [vmem:[#allocation2 + $0xa0] sm:$0xff] }
 0x627   : > { %v1498_v7 = vmax.f32 %v1496_v13, %v1497_v35  ;;  %v1579_v17 = vmax.f32 %v1577_v45, %v1578_v47  ;;  %v1505_v19 = vsel %vm672_vm0, %v3489_v57, -inf  ;;  %v1506_v30 = vsel %vm672_vm0, %v3491_v59, -inf  ;;  %v3499_v32 = vld [vmem:[#allocation2 + $0xa8] sm:$0xff]  ;;  %v3501_v44 = vld [vmem:[#allocation2 + $0x20] sm:$0xff]  ;;  %v3509_v20 = vld [vmem:[#allocation2 + $0xb0] sm:$0xff] }
 0x628   : > { %v3503_v48 = vld [vmem:[#allocation2 + $0x28] sm:$0xff]  ;;  %v1571_v49 = vrot.slane %v1570_v33, 4  ;;  %v1507_v50 = vmax.f32 %v1505_v19, %v1506_v30  ;;  %v1586_v34 = vsel %vm672_vm0, %v3493_v5, -inf  ;;  %v1587_v12 = vsel %vm672_vm0, %v3499_v32, -inf  ;;  %v3513_v36 = vld [vmem:[#allocation2 + $0xb8] sm:$0xff]  ;;  %v3515_v38 = vld [vmem:[#allocation2 + $0x30] sm:$0xff] }
 0x629   : > { %v1499_v0 = vrot.slane %v1498_v7, 4  ;;  %v1580_v25 = vrot.slane %v1579_v17, 4  ;;  %v1588_v23 = vmax.f32 %v1586_v34, %v1587_v12  ;;  %v1514_v18 = vsel %vm672_vm0, %v3501_v44, -inf  ;;  %v3521_v2 = vld [vmem:[#allocation2 + $0x38] sm:$0xff] }
 0x62a   : > { %v1572_v41 = vmax.f32 %v1570_v33, %v1571_v49  ;;  %v1508_v46 = vrot.slane %v1507_v50, 4  ;;  %v1515_v27 = vsel %vm672_vm0, %v3503_v48, -inf  ;;  %v1595_v51 = vsel %vm672_vm0, %v3509_v20, -inf }
 0x62b   : > { %v1500_v55 = vmax.f32 %v1498_v7, %v1499_v0  ;;  %v1581_v58 = vmax.f32 %v1579_v17, %v1580_v25  ;;  %v1589_v62 = vrot.slane %v1588_v23, 4  ;;  %v1516_v1 = vmax.f32 %v1514_v18, %v1515_v27 }
 0x62c   : > { %v1573_v3 = vrot.slane %v1572_v41, 2  ;;  %v1509_v4 = vmax.f32 %v1507_v50, %v1508_v46  ;;  %v1596_v6 = vsel %vm672_vm0, %v3513_v36, -inf  ;;  %v1523_v28 = vsel %vm672_vm0, %v3515_v38, -inf }
 0x62d   : > { %v1501_v37 = vrot.slane %v1500_v55, 2  ;;  %v1582_v8 = vrot.slane %v1581_v58, 2  ;;  %v1590_v24 = vmax.f32 %v1588_v23, %v1589_v62  ;;  %v1517_v31 = vrot.slane %v1516_v1, 4 }
 0x62e   : > { %v1574_v9 = vmax.f32 %v1572_v41, %v1573_v3  ;;  %v1510_v52 = vrot.slane %v1509_v4, 2  ;;  %v1597_v10 = vmax.f32 %v1595_v51, %v1596_v6  ;;  %v1524_v53 = vsel %vm672_vm0, %v3521_v2, -inf }
 0x62f   : > { %v1502_v11 = vmax.f32 %v1500_v55, %v1501_v37  ;;  %v1583_v60 = vmax.f32 %v1581_v58, %v1582_v8  ;;  %v1591_v61 = vrot.slane %v1590_v24, 2  ;;  %v1518_v14 = vmax.f32 %v1516_v1, %v1517_v31  ;;  %v3537_v55 = vld [vmem:[#allocation2 + $0xc0] sm:$0xff] }
 0x630   : > { %v1575_v15 = vrot.slane %v1574_v9, 1  ;;  %v1511_v43 = vmax.f32 %v1509_v4, %v1510_v52  ;;  %v1598_v54 = vrot.slane %v1597_v10, 4  ;;  %v1525_v40 = vmax.f32 %v1523_v28, %v1524_v53  ;;  %v3541_v4 = vld [vmem:[#allocation2 + $0xc8] sm:$0xff] }
 0x631   : > { %v1503_v16 = vrot.slane %v1502_v11, 1  ;;  %v1584_v26 = vrot.slane %v1583_v60, 1  ;;  %v1592_v42 = vmax.f32 %v1590_v24, %v1591_v61  ;;  %v1519_v13 = vrot.slane %v1518_v14, 2  ;;  %v3550_v24 = vld [vmem:[#allocation2 + $0x40] sm:$0xff]  ;;  %v3558_v61 = vld [vmem:[#allocation2 + $0x48] sm:$0xff] }
 0x632   : > { %v1576_v33 = vmax.f32 %v1574_v9, %v1575_v15  ;;  %v1512_v35 = vrot.slane %v1511_v43, 1  ;;  %v1599_v45 = vmax.f32 %v1597_v10, %v1598_v54  ;;  %v1526_v47 = vrot.slane %v1525_v40, 4  ;;  %v3562_v15 = vld [vmem:[#allocation2 + $0xd0] sm:$0xff] }
 0x633   : > { %v1504_v7 = vmax.f32 %v1502_v11, %v1503_v16  ;;  %v1585_v17 = vmax.f32 %v1583_v60, %v1584_v26  ;;  %v1593_v19 = vrot.slane %v1592_v42, 1  ;;  %v1520_v30 = vmax.f32 %v1518_v14, %v1519_v13 }
 0x634   : > { %v1656_v49 = vsub.f32 %v3465_v56, %v1576_v33  ;;  %v1657_v50 = vsub.f32 %v3467_v63, %v1576_v33  ;;  %v1513_v34 = vmax.f32 %v1511_v43, %v1512_v35  ;;  %v1600_v12 = vrot.slane %v1599_v45, 2 }
 0x635   : > { %v1640_v0 = vsub.f32 %v3469_v22, %v1504_v7  ;;  %v1641_v25 = vsub.f32 %v3475_v39, %v1504_v7  ;;  %v1658_v23 = vsub.f32 %v3479_v21, %v1585_v17  ;;  %v1659_v18 = vsub.f32 %v3481_v29, %v1585_v17 }
 0x636   : > { %v1704_v41 = vmul.f32 1.442695, %v1656_v49  ;;  %v1706_v46 = vmul.f32 1.442695, %v1657_v50  ;;  %v1642_v27 = vsub.f32 %v3489_v57, %v1513_v34  ;;  %v1643_v51 = vsub.f32 %v3491_v59, %v1513_v34  ;;  %v3546_v57 = vld [vmem:[%s3896_s5] sm:$0xff]  }
 0x637   : > { %v1672_v56 = vmul.f32 1.442695, %v1640_v0  ;;  %v1674_v63 = vmul.f32 1.442695, %v1641_v25  ;;  %v1708_v58 = vmul.f32 1.442695, %v1658_v23  ;;  %v1594_v62 = vmax.f32 %v1592_v42, %v1593_v19  ;;  %2651 = vmatprep.mubr.msk.bf16.mxu0 %vm672_vm0, %v3546_v57 }
 0x638   : > { %2860 = vpow2.f32 %v1704_v41  ;;  %v1710_v22 = vmul.f32 1.442695, %v1659_v18  ;;  %v1676_v1 = vmul.f32 1.442695, %v1642_v27  ;;  %v1678_v39 = vmul.f32 1.442695, %v1643_v51 }
 0x639   : > { %2862 = vpow2.f32 %v1706_v46  ;;  %v1660_v21 = vsub.f32 %v3493_v5, %v1594_v62  ;;  %v1661_v29 = vsub.f32 %v3499_v32, %v1594_v62  ;;  %v1521_v3 = vrot.slane %v1520_v30, 1  ;;  %v3588_v23 = vld [vmem:[#allocation2 + $0xd8] sm:$0xff] }
 0x63a   : > { %2864 = vpow2.f32 %v1672_v56  ;;  %v1601_v59 = vmax.f32 %v1599_v45, %v1600_v12  ;;  %v1527_v6 = vmax.f32 %v1525_v40, %v1526_v47  ;;  %v1604_v28 = vsel %vm672_vm0, %v3537_v55, -inf }
 0x63b   : > { %2866 = vpow2.f32 %v1674_v63  ;;  %v1712_v37 = vmul.f32 1.442695, %v1660_v21  ;;  %v1714_v8 = vmul.f32 1.442695, %v1661_v29  ;;  %v1522_v5 = vmax.f32 %v1520_v30, %v1521_v3 }
 0x63c   : > { %2868 = vpow2.f32 %v1708_v58  ;;  %v1602_v32 = vrot.slane %v1601_v59, 1  ;;  %v1528_v31 = vrot.slane %v1527_v6, 2  ;;  %v1605_v9 = vsel %vm672_vm0, %v3541_v4, -inf }
 0x63d   : > { %2870 = vpow2.f32 %v1710_v22  ;;  %v1644_v52 = vsub.f32 %v3501_v44, %v1522_v5  ;;  %v1645_v10 = vsub.f32 %v3503_v48, %v1522_v5  ;;  %v1606_v53 = vmax.f32 %v1604_v28, %v1605_v9 }
 0x63e   : > { %2872 = vpow2.f32 %v1676_v1  ;;  %v1603_v11 = vmax.f32 %v1601_v59, %v1602_v32  ;;  %v1529_v60 = vmax.f32 %v1527_v6, %v1528_v31  ;;  %v1532_v14 = vsel %vm672_vm0, %v3550_v24, -inf }
 0x63f   : > { %2874 = vpow2.f32 %v1678_v39  ;;  %v1680_v43 = vmul.f32 1.442695, %v1644_v52  ;;  %v1682_v54 = vmul.f32 1.442695, %v1645_v10  ;;  %v1607_v40 = vrot.slane %v1606_v53, 4 }
 0x640   : > { %2876 = vpow2.f32 %v1712_v37  ;;  %v1662_v44 = vsub.f32 %v3509_v20, %v1603_v11  ;;  %v1663_v48 = vsub.f32 %v3513_v36, %v1603_v11  ;;  %v1530_v16 = vrot.slane %v1529_v60, 1 }
 0x641   : > { %2878 = vpow2.f32 %v1714_v8  ;;  %v1608_v26 = vmax.f32 %v1606_v53, %v1607_v40  ;;  %v1533_v42 = vsel %vm672_vm0, %v3558_v61, -inf  ;;  %v3570_v13 = vsel %vm672_vm0, %v3562_v15, -inf }
 0x642   : > { %v3572_v33 = vpop.eup %2860  ;;  %2880 = vpow2.f32 %v1680_v43  ;;  %v1716_v35 = vmul.f32 1.442695, %v1662_v44  ;;  %v1718_v45 = vmul.f32 1.442695, %v1663_v48  ;;  %v1531_v47 = vmax.f32 %v1529_v60, %v1530_v16 }
 0x643   : > { %v3574_v7 = vpop.eup %2862  ;;  %v1808_v20 = vsel %vm672_vm0, %v3572_v33, 0.0  ;;  %2882 = vpow2.f32 %v1682_v54  ;;  %v1609_v36 = vrot.slane %v1608_v26, 2  ;;  %v1534_v17 = vmax.f32 %v1532_v14, %v1533_v42 }
 0x644   : > { %v3578_v19 = vpop.eup %2864  ;;  %v1809_v30 = vsel %vm672_vm0, %v3574_v7, 0.0  ;;  %2884 = vpow2.f32 %v1716_v35  ;;  %v1646_v49 = vsub.f32 %v3515_v38, %v1531_v47  ;;  %v1647_v50 = vsub.f32 %v3521_v2, %v1531_v47 }
 0x645   : > { %v3584_v34 = vpop.eup %2866  ;;  %v1810_v12 = vadd.f32 %v1809_v30, %v1808_v20  ;;  %v1736_v0 = vsel %vm672_vm0, %v3578_v19, 0.0  ;;  %2886 = vpow2.f32 %v1718_v45  ;;  %v1610_v25 = vmax.f32 %v1608_v26, %v1609_v36 }
 0x646   : > { %v3590_v18 = vpop.eup %2868  ;;  %v1737_v41 = vsel %vm672_vm0, %v3584_v34, 0.0  ;;  %v1684_v46 = vmul.f32 1.442695, %v1646_v49  ;;  %v1686_v27 = vmul.f32 1.442695, %v1647_v50  ;;  %v1535_v38 = vrot.slane %v1534_v17, 4 }
 0x647   : > { %v3594_v51 = vpop.eup %2870  ;;  %v1811_v2 = vrot.slane %v1810_v12, 4  ;;  %v1738_v56 = vadd.f32 %v1737_v41, %v1736_v0  ;;  %v1817_v63 = vsel %vm672_vm0, %v3590_v18, 0.0  ;;  %v1611_v58 = vrot.slane %v1610_v25, 1 }
 0x648   : > { %v3598_v62 = vpop.eup %2872  ;;  %v1818_v22 = vsel %vm672_vm0, %v3594_v51, 0.0  ;;  %2888 = vpow2.f32 %v1684_v46  ;;  %v3602_v1 = vmax.f32 %v1534_v17, %v1535_v38  ;;  %v3606_v39 = vsel %vm672_vm0, %v3588_v23, -inf }
 0x649   : > { %v3608_v21 = vpop.eup %2874  ;;  %v1812_v29 = vadd.f32 %v1811_v2, %v1810_v12  ;;  %v1739_v3 = vrot.slane %v1738_v56, 4  ;;  %v1819_v59 = vadd.f32 %v1818_v22, %v1817_v63  ;;  %v1745_v6 = vsel %vm672_vm0, %v3598_v62, 0.0 }
 0x64a   : > { %v3612_v28 = vpop.eup %2876  ;;  %v1746_v37 = vsel %vm672_vm0, %v3608_v21, 0.0  ;;  %2890 = vpow2.f32 %v1686_v27  ;;  %v1612_v8 = vmax.f32 %v1610_v25, %v1611_v58  ;;  %v1537_v5 = vrot.slane %v3602_v1, 2 }
 0x64b   : > { %v3617_v32 = vpop.eup %2878  ;;  %v1813_v31 = vrot.slane %v1812_v29, 2  ;;  %v1740_v9 = vadd.f32 %v1739_v3, %v1738_v56  ;;  %v1820_v52 = vrot.slane %v1819_v59, 4  ;;  %v1747_v10 = vadd.f32 %v1746_v37, %v1745_v6 }
 0x64c   : > { %v3619_v53 = vpop.eup %2880  ;;  %v1826_v11 = vsel %vm672_vm0, %v3612_v28, 0.0  ;;  %v1827_v60 = vsel %vm672_vm0, %v3617_v32, 0.0  ;;  %v1664_v14 = vsub.f32 %v3537_v55, %v1612_v8  ;;  %v1665_v43 = vsub.f32 %v3541_v4, %v1612_v8 }
 0x64d   : > { %v3627_v54 = vpop.eup %2882  ;;  %v1814_v40 = vadd.f32 %v1813_v31, %v1812_v29  ;;  %v1741_v44 = vrot.slane %v1740_v9, 2  ;;  %v1821_v48 = vadd.f32 %v1820_v52, %v1819_v59  ;;  %v1748_v16 = vrot.slane %v1747_v10, 4 }
 0x64e   : > { %v3629_v26 = vpop.eup %2884  ;;  %v1828_v42 = vadd.f32 %v1827_v60, %v1826_v11  ;;  %v1754_v35 = vsel %vm672_vm0, %v3619_v53, 0.0  ;;  %v1755_v45 = vsel %vm672_vm0, %v3627_v54, 0.0  ;;  %v1720_v47 = vmul.f32 1.442695, %v1664_v14  ;;  %v3649_v14 = vld [vmem:[#allocation2 + $0x50] sm:$0xff] }
 0x64f   : > { %v3635_v20 = vpop.eup %2886  ;;  %v1815_v55 = vrot.slane %v1814_v40, 1  ;;  %v1742_v4 = vadd.f32 %v1741_v44, %v1740_v9  ;;  %v1822_v36 = vrot.slane %v1821_v48, 2  ;;  %v1749_v17 = vadd.f32 %v1748_v16, %v1747_v10 }
 0x650   : > { %v1829_v30 = vrot.slane %v1828_v42, 4  ;;  %v1756_v49 = vadd.f32 %v1755_v45, %v1754_v35  ;;  %v1835_v50 = vsel %vm672_vm0, %v3629_v26, 0.0  ;;  %v1836_v12 = vsel %vm672_vm0, %v3635_v20, 0.0 }
 0x651   : > { %v1816_v0 = vadd.f32 %v1815_v55, %v1814_v40  ;;  %v1743_v25 = vrot.slane %v1742_v4, 1  ;;  %v1823_v41 = vadd.f32 %v1822_v36, %v1821_v48  ;;  %v1750_v46 = vrot.slane %v1749_v17, 2 }
 0x652   : > { %v3641_v27 = vpop.eup %2888  ;;  %v1830_v38 = vadd.f32 %v1829_v30, %v1828_v42  ;;  %v1757_v2 = vrot.slane %v1756_v49, 4  ;;  %v1837_v56 = vadd.f32 %v1836_v12, %v1835_v50  ;;  %2892 = vpow2.f32 %v1720_v47  ;;  %v3652_v47 = vld [vmem:[#allocation2 + $0x58] sm:$0xff] }
 0x653   : > { %2894 = vrcp.f32 %v1816_v0  ;;  %v1744_v63 = vadd.f32 %v1743_v25, %v1742_v4  ;;  %v1824_v58 = vrot.slane %v1823_v41, 1  ;;  %v1751_v22 = vadd.f32 %v1750_v46, %v1749_v17 }
 0x654   : > { %v3643_v29 = vpop.eup %2890  ;;  %v1831_v3 = vrot.slane %v1830_v38, 2  ;;  %v1758_v59 = vadd.f32 %v1757_v2, %v1756_v49  ;;  %v1838_v6 = vrot.slane %v1837_v56, 4  ;;  %v1763_v37 = vsel %vm672_vm0, %v3641_v27, 0.0 }
 0x655   : > { %2896 = vrcp.f32 %v1744_v63  ;;  %v1825_v8 = vadd.f32 %v1824_v58, %v1823_v41  ;;  %v1752_v31 = vrot.slane %v1751_v22, 1  ;;  %v1764_v9 = vsel %vm672_vm0, %v3643_v29, 0.0 }
 0x656   : > { %v1832_v52 = vadd.f32 %v1831_v3, %v1830_v38  ;;  %v1759_v10 = vrot.slane %v1758_v59, 2  ;;  %v1839_v11 = vadd.f32 %v1838_v6, %v1837_v56  ;;  %v1765_v60 = vadd.f32 %v1764_v9, %v1763_v37 }
 0x657   : > { %2898 = vrcp.f32 %v1825_v8  ;;  %v1753_v40 = vadd.f32 %v1752_v31, %v1751_v22  ;;  %v1722_v44 = vmul.f32 1.442695, %v1665_v43  ;;  %v1538_v48 = vmax.f32 %v3602_v1, %v1537_v5 }
 0x658   : > { %v1833_v16 = vrot.slane %v1832_v52, 1  ;;  %v1760_v42 = vadd.f32 %v1759_v10, %v1758_v59  ;;  %v1840_v35 = vrot.slane %v1839_v11, 2  ;;  %v1766_v45 = vrot.slane %v1765_v60, 4 }
 0x659   : > { %2900 = vrcp.f32 %v1753_v40  ;;  %v1539_v55 = vrot.slane %v1538_v48, 1  ;;  %v1615_v4 = vmax.f32 %v3570_v13, %v3606_v39  ;;  %v1541_v36 = vsel %vm672_vm0, %v3649_v14, -inf  ;;  %v3675_v40 = vld [vmem:[#allocation2 + $0xe8] sm:$0xff] }
 0x65a   : > { %v1834_v17 = vadd.f32 %v1833_v16, %v1832_v52  ;;  %v1761_v30 = vrot.slane %v1760_v42, 1  ;;  %v1841_v49 = vadd.f32 %v1840_v35, %v1839_v11  ;;  %v1767_v43 = vadd.f32 %v1766_v45, %v1765_v60 }
 0x65b   : > { %2902 = vpow2.f32 %v1722_v44  ;;  %v1540_v1 = vmax.f32 %v1538_v48, %v1539_v55  ;;  %v1616_v5 = vrot.slane %v1615_v4, 4  ;;  %v1542_v50 = vsel %vm672_vm0, %v3652_v47, -inf }
 0x65c   : > { %v3660_v12 = vpop.eup %2892  ;;  %2904 = vrcp.f32 %v1834_v17  ;;  %v1762_v0 = vadd.f32 %v1761_v30, %v1760_v42  ;;  %v1842_v25 = vrot.slane %v1841_v49, 1  ;;  %v1768_v41 = vrot.slane %v1767_v43, 2 }
 0x65d   : > { %v2895_v13 = vpop.eup %2894  ;;  %v1844_v39 = vsel %vm672_vm0, %v3660_v12, 0.0  ;;  %v1648_v46 = vsub.f32 %v3550_v24, %v1540_v1  ;;  %v1649_v38 = vsub.f32 %v3558_v61, %v1540_v1  ;;  %v1617_v2 = vmax.f32 %v1615_v4, %v1616_v5  ;;  %v3670_v24 = vld [vmem:[#allocation2 + $0xe0] sm:$0xff] }
 0x65e   : > { %v1912_v56 = vmul.f32 %v2895_v13, %v3572_v33  ;;  %v1913_v63 = vmul.f32 %v2895_v13, %v3574_v7  ;;  %2906 = vrcp.f32 %v1762_v0  ;;  %v1843_v58 = vadd.f32 %v1842_v25, %v1841_v49 }
 0x65f   : > { %v2897_v22 = vpop.eup %2896  ;;  %v1769_v3 = vadd.f32 %v1768_v41, %v1767_v43  ;;  %v1688_v59 = vmul.f32 1.442695, %v1648_v46  ;;  %v1690_v6 = vmul.f32 1.442695, %v1649_v38  ;;  %v1618_v37 = vrot.slane %v1617_v2, 2  ;;  %v3694_v46 = vld [vmem:[#allocation2 + $0x60] sm:$0xff] }
 0x660   : > { %v1936_v8 = vpack.c.bf16 %v1913_v63, %v1912_v56  ;;  %v1896_v31 = vmul.f32 %v2897_v22, %v3578_v19  ;;  %v1897_v9 = vmul.f32 %v2897_v22, %v3584_v34  ;;  %2908 = vrcp.f32 %v1843_v58 }
 0x661   : > { %v2899_v61 = vpop.eup %2898  ;;  %v1770_v52 = vrot.slane %v1769_v3, 1  ;;  %2910 = vpow2.f32 %v1688_v59  ;;  %v1619_v33 = vmax.f32 %v1617_v2, %v1618_v37  ;;  %v1543_v7 = vmax.f32 %v1541_v36, %v1542_v50 }
 0x662   : > { %2745 = vmatprep.subr.msk.bf16.mxu0 %vm672_vm0, %v1936_v8  ;;  %v1928_v10 = vpack.c.bf16 %v1897_v9, %v1896_v31  ;;  %v1914_v11 = vmul.f32 %v2899_v61, %v3590_v18  ;;  %v1915_v60 = vmul.f32 %v2899_v61, %v3594_v51  ;;  %2912 = vpow2.f32 %v1690_v6  ;;  %v3707_v31 = vld [vmem:[#allocation2 + $0x68] sm:$0xff]  ;;  %v3709_v9 = vld [vmem:[#allocation2 + $0xf0] sm:$0xff]  ;;  %v3711_v61 = vld [vmem:[#allocation2 + $0xf8] sm:$0xff] }
 0x663   : > { %v2901_v19 = vpop.eup %2900  ;;  %v1771_v34 = vadd.f32 %v1770_v52, %v1769_v3  ;;  %v1620_v44 = vrot.slane %v1619_v33, 1  ;;  %v1544_v48 = vrot.slane %v1543_v7, 4  ;;  %v1622_v16 = vsel %vm672_vm0, %v3670_v24, -inf }
 0x664   : > { %v1955_v42 = vsel %vm672_vm0, %v1928_v10, 0  ;;  %v1937_v35 = vpack.c.bf16 %v1915_v60, %v1914_v11  ;;  %v1898_v45 = vmul.f32 %v2901_v19, %v3598_v62  ;;  %v1899_v55 = vmul.f32 %v2901_v19, %v3608_v21 }
 0x665   : > { %v3682_v18 = vpop.eup %2902  ;;  %2636 = vmatpush3.bf16.xpose.msra.mxu0 %v1955_v42  ;;  %2914 = vrcp.f32 %v1771_v34  ;;  %v1621_v51 = vmax.f32 %v1619_v33, %v1620_v44  ;;  %v1545_v4 = vmax.f32 %v1543_v7, %v1544_v48  ;;  %v1623_v36 = vsel %vm672_vm0, %v3675_v40, -inf }
 0x666   : > { %v2905_v17 = vpop.eup %2904  ;;  %2746 = vmatprep.subr.msk.bf16.mxu0 %vm672_vm0, %v1937_v35  ;;  %v1929_v30 = vpack.c.bf16 %v1899_v55, %v1898_v45  ;;  %v1845_v49 = vsel %vm672_vm0, %v3682_v18, 0.0  ;;  %v1624_v43 = vmax.f32 %v1622_v16, %v1623_v36  ;;  %v1550_v6 = vsel %vm672_vm0, %v3694_v46, -inf }
 0x667   : > { %v1916_v62 = vmul.f32 %v2905_v17, %v3612_v28  ;;  %v1917_v21 = vmul.f32 %v2905_v17, %v3617_v32  ;;  %v1846_v1 = vadd.f32 %v1845_v49, %v1844_v39  ;;  %v1666_v5 = vsub.f32 %v3562_v15, %v1621_v51 }
 0x668   : > { %v2907_v50 = vpop.eup %2906  ;;  %v1958_v0 = vsel %vm672_vm0, %v1929_v30, 0  ;;  %v1667_v25 = vsub.f32 %v3588_v23, %v1621_v51  ;;  %v1546_v41 = vrot.slane %v1545_v4, 2  ;;  %v1625_v13 = vrot.slane %v1624_v43, 4 }
 0x669   : > { %v1938_v38 = vpack.c.bf16 %v1917_v21, %v1916_v62  ;;  %v1900_v2 = vmul.f32 %v2907_v50, %v3619_v53  ;;  %v1901_v56 = vmul.f32 %v2907_v50, %v3627_v54  ;;  %v1847_v28 = vrot.slane %v1846_v1, 4  ;;  %v3728_v50 = vld [vmem:[#allocation2 + $0x70] sm:$0xff] }
 0x66a   : > { %v2909_v63 = vpop.eup %2908  ;;  %v1724_v32 = vmul.f32 1.442695, %v1666_v5  ;;  %v1726_v39 = vmul.f32 1.442695, %v1667_v25  ;;  %v1547_v58 = vmax.f32 %v1545_v4, %v1546_v41  ;;  %v1626_v15 = vmax.f32 %v1624_v43, %v1625_v13  ;;  %v3732_v41 = vld [vmem:[#allocation2 + $0x78] sm:$0xff] }
 0x66b   : > { %v3698_v22 = vpop.eup %2910  ;;  %v1930_v3 = vpack.c.bf16 %v1901_v56, %v1900_v2  ;;  %v1918_v23 = vmul.f32 %v2909_v63, %v3629_v26  ;;  %v1848_v59 = vadd.f32 %v1847_v28, %v1846_v1  ;;  %v1919_v52 = vmul.f32 %v2909_v63, %v3635_v20 }
 0x66c   : > { %v3703_v37 = vpop.eup %2912  ;;  %v1772_v53 = vsel %vm672_vm0, %v3698_v22, 0.0  ;;  %2916 = vpow2.f32 %v1724_v32  ;;  %v1548_v54 = vrot.slane %v1547_v58, 1  ;;  %v1627_v8 = vrot.slane %v1626_v15, 2 }
 0x66d   : > { %2638 = vmatpush3.bf16.xpose.msra.mxu0 %v1958_v0  ;;  %v1961_v26 = vsel %vm672_vm0, %v1930_v3, 0  ;;  %v1849_v33 = vrot.slane %v1848_v59, 2  ;;  %v1773_v7 = vsel %vm672_vm0, %v3703_v37, 0.0  ;;  %2918 = vpow2.f32 %v1726_v39 }
 0x66e   : > { %2747 = vmatprep.subr.msk.bf16.mxu0 %vm672_vm0, %v1938_v38  ;;  %v1774_v10 = vadd.f32 %v1773_v7, %v1772_v53  ;;  %v1549_v11 = vmax.f32 %v1547_v58, %v1548_v54  ;;  %v1628_v60 = vmax.f32 %v1626_v15, %v1627_v8  ;;  %v1551_v44 = vsel %vm672_vm0, %v3707_v31, -inf }
 0x66f   : > { %v2915_v19 = vpop.eup %2914  ;;  %v1850_v34 = vadd.f32 %v1849_v33, %v1848_v59  ;;  %v1631_v48 = vsel %vm672_vm0, %v3709_v9, -inf  ;;  %v1632_v20 = vsel %vm672_vm0, %v3711_v61, -inf  ;;  %v1552_v36 = vmax.f32 %v1550_v6, %v1551_v44 }
 0x670   : > { %v1902_v16 = vmul.f32 %v2915_v19, %v3641_v27  ;;  %v1903_v42 = vmul.f32 %v2915_v19, %v3643_v29  ;;  %v1775_v35 = vrot.slane %v1774_v10, 4  ;;  %v1650_v45 = vsub.f32 %v3649_v14, %v1549_v11 }
 0x671   : > { %v1851_v55 = vrot.slane %v1850_v34, 1  ;;  %v1651_v51 = vsub.f32 %v3652_v47, %v1549_v11  ;;  %v1629_v4 = vrot.slane %v1628_v60, 1  ;;  %v1939_v17 = vpack.c.bf16 %v1919_v52, %v1918_v23 }
 0x672   : > { %v1776_v30 = vadd.f32 %v1775_v35, %v1774_v10  ;;  %v1692_v49 = vmul.f32 1.442695, %v1650_v45  ;;  %v1633_v43 = vmax.f32 %v1631_v48, %v1632_v20  ;;  %v1553_v5 = vrot.slane %v1552_v36, 4 }
 0x673   : > { %v1852_v62 = vadd.f32 %v1851_v55, %v1850_v34  ;;  %v1694_v21 = vmul.f32 1.442695, %v1651_v51  ;;  %v1630_v1 = vmax.f32 %v1628_v60, %v1629_v4  ;;  %v1931_v27 = vpack.c.bf16 %v1903_v42, %v1902_v16 }
 0x674   : > { %v1777_v29 = vrot.slane %v1776_v30, 2  ;;  %2920 = vpow2.f32 %v1692_v49  ;;  %v1634_v0 = vrot.slane %v1633_v43, 4  ;;  %v1554_v25 = vmax.f32 %v1552_v36, %v1553_v5 }
 0x675   : > { %2640 = vmatpush3.bf16.xpose.msra.mxu0 %v1961_v26  ;;  %2922 = vrcp.f32 %v1852_v62  ;;  %v1668_v14 = vsub.f32 %v3670_v24, %v1630_v1  ;;  %v1669_v47 = vsub.f32 %v3675_v40, %v1630_v1  ;;  %v1559_v56 = vsel %vm672_vm0, %v3728_v50, -inf }
 0x676   : > { %v3734_v13 = vpop.eup %2916  ;;  %2748 = vmatprep.subr.msk.bf16.mxu0 %vm672_vm0, %v1939_v17  ;;  %v1778_v38 = vadd.f32 %v1777_v29, %v1776_v30  ;;  %2924 = vpow2.f32 %v1694_v21  ;;  %v1635_v2 = vmax.f32 %v1633_v43, %v1634_v0  ;;  %v1555_v32 = vrot.slane %v1554_v25, 2 }
 0x677   : > { %v1853_v28 = vsel %vm672_vm0, %v3734_v13, 0.0  ;;  %v1728_v63 = vmul.f32 1.442695, %v1668_v14  ;;  %v1730_v24 = vmul.f32 1.442695, %v1669_v47  ;;  %v3741_v40 = vpop.eup %2918  ;;  %v1964_v39 = vsel %vm672_vm0, %v1931_v27, 0 }
 0x678   : > { %v1779_v58 = vrot.slane %v1778_v38, 1  ;;  %v1636_v15 = vrot.slane %v1635_v2, 2  ;;  %v1560_v3 = vsel %vm672_vm0, %v3732_v41, -inf  ;;  %v1854_v23 = vsel %vm672_vm0, %v3741_v40, 0.0 }
 0x679   : > { %2926 = vpow2.f32 %v1728_v63  ;;  %v1556_v59 = vmax.f32 %v1554_v25, %v1555_v32  ;;  %v1561_v6 = vmax.f32 %v1559_v56, %v1560_v3  ;;  %v1855_v54 = vadd.f32 %v1854_v23, %v1853_v28 }
 0x67a   : > { %v1780_v53 = vadd.f32 %v1779_v58, %v1778_v38  ;;  %2928 = vpow2.f32 %v1730_v24  ;;  %v1637_v8 = vmax.f32 %v1635_v2, %v1636_v15 }
 0x67b   : > { %v1557_v26 = vrot.slane %v1556_v59, 1  ;;  %v1562_v52 = vrot.slane %v1561_v6, 4  ;;  %v1856_v33 = vrot.slane %v1855_v54, 4 }
 0x67c   : > { %2930 = vrcp.f32 %v1780_v53  ;;  %v1638_v7 = vrot.slane %v1637_v8, 1 }
 0x67d   : > { %2642 = vmatpush3.bf16.xpose.msra.mxu0 %v1964_v39  ;;  %v1558_v10 = vmax.f32 %v1556_v59, %v1557_v26  ;;  %v1563_v11 = vmax.f32 %v1561_v6, %v1562_v52  ;;  %v1857_v19 = vadd.f32 %v1856_v33, %v1855_v54 }
 0x67e   : > { %v3748_v60 = vpop.eup %2920  ;;  %v1639_v34 = vmax.f32 %v1637_v8, %v1638_v7 }
 0x67f   : > { %v2923_v44 = vpop.eup %2922  ;;  %v1781_v48 = vsel %vm672_vm0, %v3748_v60, 0.0  ;;  %v1652_v20 = vsub.f32 %v3694_v46, %v1558_v10  ;;  %v1653_v16 = vsub.f32 %v3707_v31, %v1558_v10  ;;  %v1564_v42 = vrot.slane %v1563_v11, 2 }
 0x680   : > { %v3754_v35 = vpop.eup %2924  ;;  %v1920_v45 = vmul.f32 %v2923_v44, %v3660_v12  ;;  %v1921_v55 = vmul.f32 %v2923_v44, %v3682_v18  ;;  %v1858_v51 = vrot.slane %v1857_v19, 2  ;;  %v1670_v4 = vsub.f32 %v3709_v9, %v1639_v34 }
 0x681   : > { %v1782_v36 = vsel %vm672_vm0, %v3754_v35, 0.0  ;;  %v1696_v17 = vmul.f32 1.442695, %v1652_v20  ;;  %v1698_v30 = vmul.f32 1.442695, %v1653_v16  ;;  %v1671_v49 = vsub.f32 %v3711_v61, %v1639_v34 }
 0x682   : > { %v1940_v46 = vpack.c.bf16 %v1921_v55, %v1920_v45  ;;  %v1859_v43 = vadd.f32 %v1858_v51, %v1857_v19  ;;  %v1783_v31 = vadd.f32 %v1782_v36, %v1781_v48  ;;  %v1732_v62 = vmul.f32 1.442695, %v1670_v4 }
 0x683   : > { %v3762_v21 = vpop.eup %2926  ;;  %2932 = vpow2.f32 %v1696_v17  ;;  %v1734_v12 = vmul.f32 1.442695, %v1671_v49  ;;  %v1565_v1 = vmax.f32 %v1563_v11, %v1564_v42 }
 0x684   : > { %v3764_v18 = vpop.eup %2928  ;;  %2749 = vmatprep.subr.msk.bf16.mxu0 %vm672_vm0, %v1940_v46  ;;  %v1860_v9 = vrot.slane %v1859_v43, 1  ;;  %v1784_v5 = vrot.slane %v1783_v31, 4  ;;  %v1862_v27 = vsel %vm672_vm0, %v3762_v21, 0.0  ;;  %2934 = vpow2.f32 %v1698_v30 }
 0x685   : > { %v1863_v61 = vsel %vm672_vm0, %v3764_v18, 0.0  ;;  %2936 = vpow2.f32 %v1732_v62  ;;  %v1566_v29 = vrot.slane %v1565_v1, 1 }
 0x686   : > { %v2931_v0 = vpop.eup %2930  ;;  %v1861_v14 = vadd.f32 %v1860_v9, %v1859_v43  ;;  %v1785_v47 = vadd.f32 %v1784_v5, %v1783_v31  ;;  %v1864_v25 = vadd.f32 %v1863_v61, %v1862_v27  ;;  %2938 = vpow2.f32 %v1734_v12 }
 0x687   : > { %v1904_v38 = vmul.f32 %v2931_v0, %v3698_v22  ;;  %v1905_v2 = vmul.f32 %v2931_v0, %v3703_v37  ;;  %v1567_v56 = vmax.f32 %v1565_v1, %v1566_v29 }
 0x688   : > { %2940 = vrcp.f32 %v1861_v14  ;;  %v1786_v28 = vrot.slane %v1785_v47, 2  ;;  %v1865_v63 = vrot.slane %v1864_v25, 4 }
 0x689   : > { %v1932_v24 = vpack.c.bf16 %v1905_v2, %v1904_v38  ;;  %v1654_v32 = vsub.f32 %v3728_v50, %v1567_v56  ;;  %v1655_v39 = vsub.f32 %v3732_v41, %v1567_v56 }
 0x68a   : > { %v1787_v58 = vadd.f32 %v1786_v28, %v1785_v47  ;;  %v1866_v15 = vadd.f32 %v1865_v63, %v1864_v25 }
 0x68b   : > { %v1967_v3 = vsel %vm672_vm0, %v1932_v24, 0  ;;  %v1700_v23 = vmul.f32 1.442695, %v1654_v32  ;;  %v1702_v59 = vmul.f32 1.442695, %v1655_v39 }
 0x68c   : > { %2644 = vmatpush3.bf16.xpose.msra.mxu0 %v1967_v3  ;;  %v1788_v6 = vrot.slane %v1787_v58, 1  ;;  %v1867_v22 = vrot.slane %v1866_v15, 2 }
 0x68d   : > { %v2933_v53 = vpop.eup %2932  ;;  %2942 = vpow2.f32 %v1700_v23 }
 0x68e   : > { %v2935_v37 = vpop.eup %2934  ;;  %v1789_v54 = vadd.f32 %v1788_v6, %v1787_v58  ;;  %v1868_v8 = vadd.f32 %v1867_v22, %v1866_v15  ;;  %v1790_v26 = vsel %vm672_vm0, %v2933_v53, 0.0  ;;  %2944 = vpow2.f32 %v1702_v59 }
 0x68f   : > { %v2937_v50 = vpop.eup %2936  ;;  %v1791_v41 = vsel %vm672_vm0, %v2935_v37, 0.0 }
 0x690   : > { %v2939_v52 = vpop.eup %2938  ;;  %2946 = vrcp.f32 %v1789_v54  ;;  %v1869_v33 = vrot.slane %v1868_v8, 1  ;;  %v1792_v7 = vadd.f32 %v1791_v41, %v1790_v26  ;;  %v1871_v10 = vsel %vm672_vm0, %v2937_v50, 0.0 }
 0x691   : > { %v1872_v11 = vsel %vm672_vm0, %v2939_v52, 0.0 }
 0x692   : > { %v2941_v19 = vpop.eup %2940  ;;  %v1870_v34 = vadd.f32 %v1869_v33, %v1868_v8  ;;  %v1793_v44 = vrot.slane %v1792_v7, 4  ;;  %v1873_v48 = vadd.f32 %v1872_v11, %v1871_v10 }
 0x693   : > { %v1922_v20 = vmul.f32 %v2941_v19, %v3734_v13  ;;  %v1923_v16 = vmul.f32 %v2941_v19, %v3741_v40 }
 0x694   : > { %2948 = vrcp.f32 %v1870_v34  ;;  %v1794_v42 = vadd.f32 %v1793_v44, %v1792_v7  ;;  %v1874_v45 = vrot.slane %v1873_v48, 4  ;;  %v2077_v7 = vlaneseq }
 0x695   : > { %v1941_v55 = vpack.c.bf16 %v1923_v16, %v1922_v20 }
 0x696   : > { %v1795_v51 = vrot.slane %v1794_v42, 2  ;;  %v1875_v4 = vadd.f32 %v1874_v45, %v1873_v48  ;;  %v3801_v34 = vshrl.u32 %v2077_v7, 7 }
 0x697   : > { %v2943_v36 = vpop.eup %2942  ;;  %2750 = vmatprep.subr.msk.bf16.mxu0 %vm672_vm0, %v1941_v55 }
 0x698   : > { %v2945_v17 = vpop.eup %2944  ;;  %v1796_v30 = vadd.f32 %v1795_v51, %v1794_v42  ;;  %v1876_v49 = vrot.slane %v1875_v4, 2  ;;  %v1799_v46 = vsel %vm672_vm0, %v2943_v36, 0.0  ;;  %v3806_v48 = vsub.s32 2, %v3801_v34 }
 0x699   : > { %v1800_v43 = vsel %vm672_vm0, %v2945_v17, 0.0  ;;  %v3809_v20 = vsub.s32 0, %v3801_v34  ;;  %v3814_v55 = vsub.s32 1, %v3801_v34 }
 0x69a   : > { %v2947_v31 = vpop.eup %2946  ;;  %v1797_v13 = vrot.slane %v1796_v30, 1  ;;  %v1877_v62 = vadd.f32 %v1876_v49, %v1875_v4  ;;  %v1801_v40 = vadd.f32 %v1800_v43, %v1799_v46 }
 0x69b   : > { %v1906_v12 = vmul.f32 %v2947_v31, %v3748_v60  ;;  %v1907_v1 = vmul.f32 %v2947_v31, %v3754_v35 }
 0x69c   : > { %v1798_v9 = vadd.f32 %v1797_v13, %v1796_v30  ;;  %v1878_v5 = vrot.slane %v1877_v62, 1  ;;  %v1802_v27 = vrot.slane %v1801_v40, 4 }
 0x69d   : > { %v1933_v61 = vpack.c.bf16 %v1907_v1, %v1906_v12 }
 0x69e   : > { %v2949_v29 = vpop.eup %2948  ;;  %2950 = vrcp.f32 %v1798_v9  ;;  %v1879_v0 = vadd.f32 %v1878_v5, %v1877_v62  ;;  %v1803_v14 = vadd.f32 %v1802_v27, %v1801_v40 }
 0x69f   : > { %v1970_v47 = vsel %vm672_vm0, %v1933_v61, 0  ;;  %v1924_v25 = vmul.f32 %v2949_v29, %v3762_v21  ;;  %v1925_v38 = vmul.f32 %v2949_v29, %v3764_v18 }
 0x6a0   : > { %2646 = vmatpush3.bf16.xpose.msra.mxu0 %v1970_v47  ;;  %2952 = vrcp.f32 %v1879_v0  ;;  %v1804_v2 = vrot.slane %v1803_v14, 2 }
 0x6a1   : > { %v1942_v60 = vpack.c.bf16 %v1925_v38, %v1924_v25 }
 0x6a2   : > { %v1805_v56 = vadd.f32 %v1804_v2, %v1803_v14 }
 0x6a3   : > { %2751 = vmatprep.subr.msk.bf16.mxu0 %vm672_vm0, %v1942_v60 }
 0x6a4   : > { %v1806_v35 = vrot.slane %v1805_v56, 1 }
 0x6a6   : > { %v1807_v28 = vadd.f32 %v1806_v35, %v1805_v56 }
 0x6a8   : > { %v2951_v63 = vpop.eup %2950  ;;  %2954 = vrcp.f32 %v1807_v28 }
 0x6a9   : > { %v1908_v24 = vmul.f32 %v2951_v63, %v2933_v53  ;;  %v1909_v32 = vmul.f32 %v2951_v63, %v2935_v37  ;;  %v2974_v53 = vmov 0   ;;  %v2975_v37 = vmov 0.0  }
 0x6aa   : > { %v2953_v39 = vpop.eup %2952  ;;  %2858 = vset.pattern.permute.xlu0 %v2974_v53  ;;  %2045 = vst.msk [vmem:[#allocation4] sm:$0xff] %vm672_vm0, %v2975_v37  ;;  %2046 = vst.msk [vmem:[#allocation4 + $0x18] sm:$0xff] %vm672_vm0, %v2975_v37 }
 0x6ab   : > { %v1934_v58 = vpack.c.bf16 %v1909_v32, %v1908_v24  ;;  %v1926_v15 = vmul.f32 %v2953_v39, %v2937_v50  ;;  %v1927_v3 = vmul.f32 %v2953_v39, %v2939_v52  ;;  %2048 = vst.msk [vmem:[#allocation4 + $0x10] sm:$0xff] %vm2047_vm2, %v2975_v37  ;;  %2049 = vst.msk [vmem:[#allocation4 + $0x28] sm:$0xff] %vm2047_vm2, %v2975_v37  ;;  %v2104_v52 = vld [vmem:[#allocation5] sm:$0x1]  ;;  %v2078_v37 = vand.u32 127, %v2077_v7 }
 0x6ad   : > { %v1973_v21 = vsel %vm672_vm0, %v1934_v58, 0  ;;  %v1943_v18 = vpack.c.bf16 %v1927_v3, %v1926_v15 }
 0x6ae   : > { %2648 = vmatpush3.bf16.xpose.msra.mxu0 %v1973_v21 }
 0x6af   : > { %2752 = vmatprep.subr.msk.bf16.mxu0 %vm672_vm0, %v1943_v18 }
 0x6b2   : > { %v2955_v23 = vpop.eup %2954 }
 0x6b3   : > { %v1910_v59 = vmul.f32 %v2955_v23, %v2943_v36  ;;  %v1911_v6 = vmul.f32 %v2955_v23, %v2945_v17 }
 0x6b5   : > { %v1935_v22 = vpack.c.bf16 %v1911_v6, %v1910_v59 }
 0x6b7   : > { %v1976_v54 = vsel %vm672_vm0, %v1935_v22, 0 }
 0x6b8   : > { %2650 = vmatpush3.bf16.xpose.msra.mxu0 %v1976_v54 }
 0x6bf   : > { %2652 = vmatmul.mubr.msk.bf16.vlgmr.msra.gmra.mrb[0].mxu0 %vm672_vm0, %v3546_v57 }
 0x792   : > { %v2036_v8 = vpop.f32.mrb[0].mxu0 }
 0x793   : > { %2054 = vrot.lane.b32.xlu0 %v2036_v8, %s2976_s24  ;;  %v2038_v26 = vpop.f32.mrb[1].mxu0 }
 0x794   : > { %v2040_v50 = vpop.f32.mrb[2].mxu0 }
 0x795   : > { %2058 = vrot.lane.b32.xlu1 %v2040_v50, %s2976_s24  ;;  %v2042_v41 = vpop.f32.mrb[3].mxu0  ;;  %v2079_v50 = vadd.s32 128, %v2078_v37 }
 0x797   : > { %2056 = vrot.lane.b32.xlu0 %v2038_v26, %s2976_s24 }
 0x799   : > { %2060 = vrot.lane.b32.xlu1 %v2042_v41, %s2976_s24 }
 0x79b   : > { %2107 = vperm.xlu0 %2858, %v2104_v52  }
 0x805   : > { %v2055_v57 = vpop.permute.xlu0 %2054 }
 0x806   : > { %2071 = vst.msk [vmem:[#allocation4] sm:$0xff] %vm2070_vm3, %v2055_v57 }
 0x807   : > { %v2059_v33 = vpop.permute.xlu1 %2058 }
 0x808   : > { %2074 = vst.msk [vmem:[#allocation4 + $0x18] sm:$0xff] %vm2070_vm3, %v2059_v33 }
 0x809   : > { %v2057_v10 = vpop.permute.xlu0 %2056 }
 0x80a   : > { %v2062_v11 = vsel %vm672_vm0, %v2055_v57, %v2057_v10  ;;  %2073 = vst.msk [vmem:[#allocation4 + $0x10] sm:$0xff] %vm672_vm0, %v2057_v10  ;;  %v2084_v57 = vand.u32 15, %v2078_v37 }
 0x80b   : > { %2072 = vst [vmem:[#allocation4 + $0x8] sm:$0xff] %v2062_v11  ;;  %v2061_v19 = vpop.permute.xlu1 %2060 }
 0x80c   : > { %v2063_v44 = vsel %vm672_vm0, %v2059_v33, %v2061_v19  ;;  %2076 = vst.msk [vmem:[#allocation4 + $0x28] sm:$0xff] %vm672_vm0, %v2061_v19  ;;  %v2091_v33 = vand.u32 15, %v2079_v50  ;;  %vm3842_vm5 = vcmp.ge.s32.totalorder %v2084_v57, 1  ;;  %vm3855_vm9 = vcmp.le.s32.totalorder %v2084_v57, 14 }
 0x80d   : > { %2075 = vst [vmem:[#allocation4 + $0x20] sm:$0xff] %v2063_v44  ;;  %vm2401_vm0 = vcmp.lt.s32.totalorder %v2077_v7, 256 }
 0x80e   : > { %vm3846_vm6 = vcmp.ge.s32.totalorder %v2091_v33, 1  ;;  %vm3859_vm11 = vcmp.le.s32.totalorder %v2091_v33, 14 }
 0x812   : > { %v2115_v16 = vld [vmem:[#allocation4] ss:$8 sm:$0x7]  ;;  %v2147_v51 = vld [vmem:[#allocation4 + $0x1] ss:$8 sm:$0x7] }
 0x813   : > { %v2130_v42 = vrot.slane %v2115_v16, %v3806_v48  ;;  %v2122_v45 = vrot.slane %v2115_v16, %v3809_v20  ;;  %v2156_v4 = vrot.slane %v2147_v51, %v3814_v55  ;;  %v2126_v36 = vrot.slane %v2115_v16, %v3814_v55  ;;  %v2175_v17 = vld [vmem:[#allocation4 + $0x2] ss:$8 sm:$0x7]  ;;  %v2207_v31 = vld [vmem:[#allocation4 + $0x3] ss:$8 sm:$0x7] }
 0x814   : > { %v2182_v30 = vrot.slane %v2175_v17, %v3809_v20  ;;  %v2152_v49 = vrot.slane %v2147_v51, %v3809_v20  ;;  %v2190_v46 = vrot.slane %v2175_v17, %v3806_v48  ;;  %v2160_v43 = vrot.slane %v2147_v51, %v3806_v48  ;;  %v2237_v40 = vld [vmem:[#allocation4 + $0x4] ss:$8 sm:$0x7]  ;;  %v2264_v27 = vld [vmem:[#allocation4 + $0x5] ss:$8 sm:$0x7] }
 0x815   : > { %2135 = vrot.lane.b32.xlu0 %v2130_v42, %s2977_s25  ;;  %2131 = vrot.lane.b32.xlu1 %v2122_v45, %s2977_s25  ;;  %v2216_v13 = vrot.slane %v2207_v31, %v3814_v55  ;;  %v2186_v62 = vrot.slane %v2175_v17, %v3814_v55  ;;  %v2242_v12 = vrot.slane %v2237_v40, %v3809_v20  ;;  %v2294_v0 = vld [vmem:[#allocation4 + $0x6] ss:$8 sm:$0x7]  ;;  %v2324_v2 = vld [vmem:[#allocation4 + $0x7] ss:$8 sm:$0x7] }
 0x816   : > { %v2212_v1 = vrot.slane %v2207_v31, %v3809_v20  ;;  %v2250_v9 = vrot.slane %v2237_v40, %v3806_v48  ;;  %v2220_v5 = vrot.slane %v2207_v31, %v3806_v48  ;;  %v2273_v61 = vrot.slane %v2264_v27, %v3814_v55  ;;  %v2352_v35 = vld [vmem:[#allocation4 + $0x18] ss:$8 sm:$0x7] }
 0x817   : > { %v2246_v29 = vrot.slane %v2237_v40, %v3814_v55  ;;  %v2299_v14 = vrot.slane %v2294_v0, %v3809_v20  ;;  %v2269_v47 = vrot.slane %v2264_v27, %v3809_v20  ;;  %v2307_v25 = vrot.slane %v2294_v0, %v3806_v48 }
 0x818   : > { %v2277_v38 = vrot.slane %v2264_v27, %v3806_v48  ;;  %v2333_v60 = vrot.slane %v2324_v2, %v3814_v55  ;;  %v2303_v56 = vrot.slane %v2294_v0, %v3814_v55  ;;  %v2329_v28 = vrot.slane %v2324_v2, %v3809_v20 }
 0x819   : > { %2163 = vrot.lane.b32.xlu0 %v2156_v4, %s2978_s27  ;;  %2133 = vrot.lane.b32.xlu1 %v2126_v36, %s2977_s25  ;;  %v2357_v63 = vrot.slane %v2352_v35, %v3809_v20  ;;  %v2337_v24 = vrot.slane %v2324_v2, %v3806_v48  ;;  %v2365_v32 = vrot.slane %v2352_v35, %v3806_v48 }
 0x81a   : > { %v2361_v39 = vrot.slane %v2352_v35, %v3814_v55  ;;  %v2108_v58 = vpop.permute.xlu0 %2107 }
 0x81b   : > { %v2113_v51 = vrot.slane %v2108_v58, %v3809_v20 }
 0x81d   : > { %2191 = vrot.lane.b32.xlu0 %v2182_v30, %s2979_s28  ;;  %2161 = vrot.lane.b32.xlu1 %v2152_v49, %s2978_s27 }
 0x821   : > { %2195 = vrot.lane.b32.xlu0 %v2190_v46, %s2979_s28  ;;  %2165 = vrot.lane.b32.xlu1 %v2160_v43, %s2978_s27 }
 0x825   : > { %2223 = vrot.lane.b32.xlu0 %v2216_v13, %s2980_s29  ;;  %2193 = vrot.lane.b32.xlu1 %v2186_v62, %s2979_s28 }
 0x829   : > { %2251 = vrot.lane.b32.xlu0 %v2242_v12, %s2981_s6  ;;  %2221 = vrot.lane.b32.xlu1 %v2212_v1, %s2980_s29 }
 0x82d   : > { %2255 = vrot.lane.b32.xlu0 %v2250_v9, %s2981_s6  ;;  %2225 = vrot.lane.b32.xlu1 %v2220_v5, %s2980_s29 }
 0x831   : > { %2280 = vrot.lane.b32.xlu0 %v2273_v61, %s2982_s30  ;;  %2253 = vrot.lane.b32.xlu1 %v2246_v29, %s2981_s6 }
 0x835   : > { %2308 = vrot.lane.b32.xlu0 %v2299_v14, %s2983_s8  ;;  %2278 = vrot.lane.b32.xlu1 %v2269_v47, %s2982_s30 }
 0x839   : > { %2312 = vrot.lane.b32.xlu0 %v2307_v25, %s2983_s8  ;;  %2282 = vrot.lane.b32.xlu1 %v2277_v38, %s2982_s30 }
 0x83d   : > { %2340 = vrot.lane.b32.xlu0 %v2333_v60, %s2984_s9  ;;  %2310 = vrot.lane.b32.xlu1 %v2303_v56, %s2983_s8 }
 0x841   : > { %2338 = vrot.lane.b32.xlu1 %v2329_v28, %s2984_s9  ;;  %2366 = vrot.lane.b32.xlu0 %v2357_v63, %s2985_s10 }
 0x845   : > { %2342 = vrot.lane.b32.xlu1 %v2337_v24, %s2984_s9  ;;  %2370 = vrot.lane.b32.xlu0 %v2365_v32, %s2985_s10 }
 0x849   : > { %2368 = vrot.lane.b32.xlu1 %v2361_v39, %s2985_s10 }
 0x887   : > { %v2136_v15 = vpop.permute.xlu0 %2135  ;;  %v2132_v3 = vpop.permute.xlu1 %2131 }
 0x88b   : > { %v2164_v21 = vpop.permute.xlu0 %2163  ;;  %v2134_v18 = vpop.permute.xlu1 %2133 }
 0x88c   : > { %v2138_v44 = vsel %vm2137_vm4, %v2132_v3, %v2134_v18  ;;  %v2139_v16 = vsel %vm2137_vm4, %v2134_v18, %v2136_v15 }
 0x88d   : > { %v2142_v42 = vsel %vm3842_vm5, %v2138_v44, 0.0  ;;  %v2143_v4 = vsel %vm3846_vm6, %v2139_v16, 0.0 }
 0x88e   : > { %v2144_v17 = vadd.f32 %v2142_v42, %v2113_v51  ;;  %v2145_v62 = vadd.f32 %v2143_v4, %v2113_v51 }
 0x88f   : > { %v2192_v23 = vpop.permute.xlu0 %2191  ;;  %v2162_v59 = vpop.permute.xlu1 %2161 }
 0x890   : > { %v2168_v43 = vsel %vm2167_vm8, %v2162_v59, %v2164_v21  ;;  %v2986_v59 = vmov 1966171168  }
 0x891   : > { %v2172_v5 = vadd.f32 %v2168_v43, %v2144_v17 }
 0x893   : > { %v2196_v6 = vpop.permute.xlu0 %2195  ;;  %v2166_v22 = vpop.permute.xlu1 %2165 }
 0x894   : > { %v2169_v31 = vsel %vm2167_vm8, %v2164_v21, %v2166_v22 }
 0x895   : > { %v2173_v27 = vadd.f32 %v2169_v31, %v2145_v62 }
 0x897   : > { %v2224_v54 = vpop.permute.xlu0 %2223  ;;  %v2194_v53 = vpop.permute.xlu1 %2193 }
 0x898   : > { %v2198_v49 = vsel %vm2197_vm7, %v2192_v23, %v2194_v53  ;;  %v2199_v46 = vsel %vm2197_vm7, %v2194_v53, %v2196_v6  ;;  %v2385_v6 = vunpack.c.l.s4 %v2986_v59 }
 0x899   : > { %v2202_v1 = vsel %vm3855_vm9, %v2198_v49, 0.0  ;;  %v2203_v9 = vsel %vm3859_vm11, %v2199_v46, 0.0 }
 0x89a   : > { %v2204_v47 = vadd.f32 %v2202_v1, %v2172_v5  ;;  %v2205_v25 = vadd.f32 %v2203_v9, %v2173_v27 }
 0x89b   : > { %v2252_v8 = vpop.permute.xlu0 %2251  ;;  %v2222_v26 = vpop.permute.xlu1 %2221 }
 0x89c   : > { %v2228_v40 = vsel %vm2227_vm10, %v2222_v26, %v2224_v54 }
 0x89d   : > { %v2232_v61 = vsel %vm3842_vm5, %v2228_v40, 0.0 }
 0x89e   : > { %v2234_v60 = vadd.f32 %v2232_v61, %v2204_v47 }
 0x89f   : > { %v2256_v41 = vpop.permute.xlu0 %2255  ;;  %v2226_v52 = vpop.permute.xlu1 %2225 }
 0x8a0   : > { %v2229_v12 = vsel %vm2227_vm10, %v2224_v54, %v2226_v52 }
 0x8a1   : > { %v2233_v29 = vsel %vm3846_vm6, %v2229_v12, 0.0 }
 0x8a2   : > { %v2235_v56 = vadd.f32 %v2233_v29, %v2205_v25 }
 0x8a3   : > { %v2281_v10 = vpop.permute.xlu0 %2280  ;;  %v2254_v11 = vpop.permute.xlu1 %2253 }
 0x8a4   : > { %v2257_v2 = vsel %vm969_vm1, %v2252_v8, %v2254_v11  ;;  %v2258_v63 = vsel %vm969_vm1, %v2254_v11, %v2256_v41  ;;  %v2386_v41 = vunpack.c.0.s8 %v2385_v6 }
 0x8a5   : > { %v2261_v39 = vadd.f32 %v2257_v2, %v2234_v60  ;;  %v2262_v18 = vadd.f32 %v2258_v63, %v2235_v56 }
 0x8a6   : > { %v2389_v16 = vsub.s32 %v2386_v41, %v3801_v34 }
 0x8a7   : > { %v2309_v45 = vpop.permute.xlu0 %2308  ;;  %v2279_v55 = vpop.permute.xlu1 %2278 }
 0x8a8   : > { %v2285_v38 = vsel %vm2284_vm12, %v2279_v55, %v2281_v10 }
 0x8a9   : > { %v2289_v24 = vsel %vm3855_vm9, %v2285_v38, 0.0 }
 0x8aa   : > { %v2291_v23 = vadd.f32 %v2289_v24, %v2261_v39 }
 0x8ab   : > { %v2313_v13 = vpop.permute.xlu0 %2312  ;;  %v2283_v20 = vpop.permute.xlu1 %2282 }
 0x8ac   : > { %v2286_v35 = vsel %vm2284_vm12, %v2281_v10, %v2283_v20 }
 0x8ad   : > { %v2290_v15 = vsel %vm3859_vm11, %v2286_v35, 0.0 }
 0x8ae   : > { %v2292_v53 = vadd.f32 %v2290_v15, %v2262_v18 }
 0x8af   : > { %v2341_v0 = vpop.permute.xlu0 %2340  ;;  %v2311_v14 = vpop.permute.xlu1 %2310 }
 0x8b0   : > { %v2315_v28 = vsel %vm2314_vm13, %v2309_v45, %v2311_v14  ;;  %v2316_v58 = vsel %vm2314_vm13, %v2311_v14, %v2313_v13 }
 0x8b1   : > { %v2319_v3 = vsel %vm3842_vm5, %v2315_v28, 0.0  ;;  %v2320_v22 = vsel %vm3846_vm6, %v2316_v58, 0.0 }
 0x8b2   : > { %v2321_v37 = vadd.f32 %v2319_v3, %v2291_v23  ;;  %v2322_v50 = vadd.f32 %v2320_v22, %v2292_v53 }
 0x8b3   : > { %v2339_v32 = vpop.permute.xlu1 %2338  ;;  %v2367_v21 = vpop.permute.xlu0 %2366 }
 0x8b4   : > { %v2345_v8 = vsel %vm2344_vm14, %v2339_v32, %v2341_v0 }
 0x8b5   : > { %v2349_v33 = vadd.f32 %v2345_v8, %v2321_v37 }
 0x8b7   : > { %v2343_v54 = vpop.permute.xlu1 %2342  ;;  %v2371_v52 = vpop.permute.xlu0 %2370 }
 0x8b8   : > { %v2346_v26 = vsel %vm2344_vm14, %v2341_v0, %v2343_v54 }
 0x8b9   : > { %v2350_v10 = vadd.f32 %v2346_v26, %v2322_v50 }
 0x8bb   : > { %v2369_v57 = vpop.permute.xlu1 %2368 }
 0x8bc   : > { %v2373_v11 = vsel %vm2372_vm15, %v2367_v21, %v2369_v57  ;;  %v2374_v19 = vsel %vm2372_vm15, %v2369_v57, %v2371_v52 }
 0x8bd   : > { %v2377_v44 = vsel %vm3855_vm9, %v2373_v11, 0.0  ;;  %v2378_v48 = vsel %vm3859_vm11, %v2374_v19, 0.0 }
 0x8be   : > { %v2379_v42 = vadd.f32 %v2377_v44, %v2349_v33  ;;  %v2380_v45 = vadd.f32 %v2378_v48, %v2350_v10 }
 0x8c0   : > { %v2383_v55 = vcombine.low %v2379_v42, %v2380_v45 }
 0x8c2   : > { %v2390_v51 = vrot.slane %v2383_v55, %v2389_v16 }
 0x8c4   : > { %v2397_v4 = vrot.slane %v2390_v51, %v2389_v16 }
 0x8c6   : > { %2403 = vst.msk [vmem:[%s3055_s17] sm:$0x3] %vm2401_vm0, %v2397_v4 }
 0x8c7 PF: > { %s19_s26 = sadd.s32 1, %s2966_s26  }
 0x8c8   : > { %p16_p5 = scmp.ge.s32.totalorder %s19_s26, 4  }
 0x8ca   :  { %18 = sbr.rel (!%p16_p5) target bundleno = 3 (0x3), region = 106 }

</bundles_post_ra>
